<compile_context>
chip_gen: v7x
topology: tpu7x:2x2x1
jax: 0.10.0
libtpu: 0.0.40
codegen_flags: <defaults>
</compile_context>

<pallas_src>
import functools

import jax
import jax.numpy as jnp
from jax.experimental import pallas as pl
from jax.experimental.pallas import tpu as pltpu

BN_EPS = 1e-5  # nn.BatchNorm2d default


def _pick_images_per_block(n, lv, cin, lp):
    """Images per grid step: aim for >= ~1024 output lanes per step, keep the
    per-step input block small (<= 8 MiB), and keep >= 2 steps for megacore."""
    per_img_bytes = 4 * cin * lp * 2          # bf16 parity planes of one image
    allowed = [d for d in range(1, n + 1)
               if n % d == 0 and d <= 4
               and d * per_img_bytes <= (8 << 20)
               and (n < 2 or n // d >= 2)]
    if not allowed:
        return 1
    for d in allowed:
        if d * lv >= 1024:
            return d
    return allowed[-1]


def _conv4(x_ref, img, w, wh, lv, cout):
    """Conv output for the 4 pool positions of one image (in-kernel halo conv).

    x_ref : (4, IB, Cin, Lp) bf16  -- 4 parity planes, rows flattened with
            stride wh (halo row/col included), per image.
    img   : static image index inside the block.
    w     : (9, Cout, Cin) bf16    -- taps in (ky, kx) row-major order.
    Returns 4 values of shape (Cout, lv) f32, one per pool offset (dh, dw);
    lane q = hp*wh + wp, where wp == wh-1 is a junk column (masked / dropped).
    """
    # The 16 distinct (plane, row-offset, col-offset) slices, shared by all
    # 4 positions x 9 taps.
    sl = {}
    for p in range(4):
        plane = x_ref[p, img]                         # (Cin, Lp) bf16
        for oh in range(2):
            for ow in range(2):
                off = oh * wh + ow
                sl[(p, oh, ow)] = plane[:, off:off + lv]
    outs = []
    for dh in range(2):
        for dw in range(2):
            acc = jnp.zeros((cout, lv), jnp.float32)
            for ky in range(3):
                a, oh = (dh + ky) % 2, (dh + ky) // 2
                for kx in range(3):
                    b, ow = (dw + kx) % 2, (dw + kx) // 2
                    acc = acc + jnp.dot(
                        w[ky * 3 + kx], sl[(2 * a + b, oh, ow)],
                        preferred_element_type=jnp.float32)
            outs.append(acc)
    return outs


def _stats_kernel(x_ref, w_ref, mask_ref, sum_ref, ssq_ref, *, ib, wh, lv, cout):
    """Pass 1: recompute conv, emit per-step partial per-channel sum / sumsq."""
    w = w_ref[...]
    m = mask_ref[...]                                  # (1, lv): 1 valid, 0 junk
    tot_s = jnp.zeros((cout, 1), jnp.float32)
    tot_q = jnp.zeros((cout, 1), jnp.float32)
    for img in range(ib):
        for y in _conv4(x_ref, img, w, wh, lv, cout):
            ym = y * m
            tot_s = tot_s + jnp.sum(ym, axis=1, keepdims=True)
            tot_q = tot_q + jnp.sum(ym * y, axis=1, keepdims=True)
    sum_ref[...] = tot_s
    ssq_ref[...] = tot_q


def _bn_relu_pool_kernel(x_ref, w_ref, scale_ref, shift_ref, o_ref,
                         *, ib, wh, lv, cout):
    """Pass 2: recompute conv, BN affine, 2x2 max-pool (max of 4 slabs), ReLU."""
    w = w_ref[...]
    # Hoist the lane broadcasts out of the image / pool-position loops.
    scale = jnp.broadcast_to(scale_ref[...], (cout, lv))
    shift = jnp.broadcast_to(shift_ref[...], (cout, lv))
    for img in range(ib):
        ys = _conv4(x_ref, img, w, wh, lv, cout)
        r = ys[0] * scale + shift
        for y in ys[1:]:
            r = jnp.maximum(r, y * scale + shift)
        # ReLU commutes with max, so one ReLU after the pool is exact.
        o_ref[img] = jnp.maximum(r, 0.0).astype(o_ref.dtype)


@jax.jit
def convblock_forward(x_nchw, w_oihw, bias, gamma, beta):
    """Forward pass of ConvBlock(indim, outdim, pool=True, padding=1).

    The conv bias is ignored: under training-mode BatchNorm (batch statistics)
    it cancels exactly, so dropping it does not change the output.
    """
    del bias
    N, Cin, H, W = x_nchw.shape
    Cout = w_oihw.shape[0]
    assert H % 2 == 0 and W % 2 == 0, "MaxPool2d(2) path assumes even H, W"
    Hp, Wp = H // 2, W // 2
    Hh, Wh = Hp + 1, Wp + 1                  # parity-plane extents (halo incl.)
    Lv = Hp * Wh                             # virtual pixels / image (junk col incl.)
    Lp = Hh * Wh + 8                         # flattened plane + slack for offset Wh+1

    # ---- wrapper glue: pad=1 + space-to-depth into 4 bf16 parity planes -----
    # planes[2*a+b, n, ci, i*Wh+j] == xpad[n, ci, 2*i+a, 2*j+b]; no blow-up.
    xp = jnp.pad(x_nchw.astype(jnp.bfloat16), ((0, 0), (0, 0), (1, 1), (1, 1)))
    xp = xp.reshape(N, Cin, Hh, 2, Wh, 2)
    planes = jnp.transpose(xp, (3, 5, 0, 1, 2, 4)).reshape(4, N, Cin, Hh * Wh)
    planes = jnp.pad(planes, ((0, 0), (0, 0), (0, 0), (0, Lp - Hh * Wh)))

    # weights (Cout,Cin,3,3) -> (9, Cout, Cin) in (ky,kx) order, bf16
    w9 = jnp.transpose(w_oihw, (2, 3, 0, 1)).reshape(9, Cout, Cin).astype(jnp.bfloat16)
    # validity mask over the virtual pixel axis (junk column wp == Wp -> 0)
    mask = (jnp.arange(Lv) % Wh < Wp).astype(jnp.float32).reshape(1, Lv)

    ib = _pick_images_per_block(N, Lv, Cin, Lp)
    grid = (N // ib,)
    cparams = pltpu.CompilerParams(
        dimension_semantics=("parallel",),
        vmem_limit_bytes=48 * 1024 * 1024)   # explicit; < v7x 64 MiB physical

    x_spec = pl.BlockSpec((4, ib, Cin, Lp), lambda g: (0, g, 0, 0))
    w_spec = pl.BlockSpec((9, Cout, Cin), lambda g: (0, 0, 0))
    m_spec = pl.BlockSpec((1, Lv), lambda g: (0, 0))
    vec_spec = pl.BlockSpec((Cout, 1), lambda g: (0, 0))
    part_spec = pl.BlockSpec((None, Cout, 1), lambda g: (g, 0, 0))

    # ---- pass 1: in-kernel conv + per-step partial BN statistics ------------
    psum, pssq = pl.pallas_call(
        functools.partial(_stats_kernel, ib=ib, wh=Wh, lv=Lv, cout=Cout),
        out_shape=(jax.ShapeDtypeStruct((grid[0], Cout, 1), jnp.float32),
                   jax.ShapeDtypeStruct((grid[0], Cout, 1), jnp.float32)),
        grid=grid,
        in_specs=[x_spec, w_spec, m_spec],
        out_specs=(part_spec, part_spec),
        compiler_params=cparams,
    )(planes, w9, mask)

    # ---- tiny (Cout,) BN finalization once in XLA between the passes --------
    cnt = float(N * H * W)
    mean = jnp.sum(psum, axis=0) / cnt                     # (Cout, 1)
    var = jnp.sum(pssq, axis=0) / cnt - mean * mean        # biased (training BN)
    scale = gamma.reshape(Cout, 1).astype(jnp.float32) * jax.lax.rsqrt(var + BN_EPS)
    shift = beta.reshape(Cout, 1).astype(jnp.float32) - mean * scale

    # ---- pass 2: in-kernel conv + BN affine + ReLU + 2x2 max-pool -----------
    out_v = pl.pallas_call(
        functools.partial(_bn_relu_pool_kernel, ib=ib, wh=Wh, lv=Lv, cout=Cout),
        out_shape=jax.ShapeDtypeStruct((N, Cout, Lv), jnp.float32),
        grid=grid,
        in_specs=[x_spec, w_spec, vec_spec, vec_spec],
        out_specs=pl.BlockSpec((ib, Cout, Lv), lambda g: (g, 0, 0)),
        compiler_params=cparams,
    )(planes, w9, scale, shift)

    # Drop the per-row junk column; layout is already pooled NCHW.
    return out_v.reshape(N, Cout, Hp, Wh)[..., :Wp]


def reference_forward(x, w, b, gamma, beta, conv_dtype=jnp.float32):
    """Pure-JAX reference mirroring the PyTorch module semantics.

    conv_dtype=jnp.bfloat16 mirrors the kernel's bf16-input / f32-accum conv.
    """
    y = jax.lax.conv_general_dilated(
        x.astype(conv_dtype), w.astype(conv_dtype),
        window_strides=(1, 1), padding=((1, 1), (1, 1)),
        dimension_numbers=("NCHW", "OIHW", "NCHW"),
        preferred_element_type=jnp.float32)
    y = y + b.reshape(1, -1, 1, 1)
    mean = jnp.mean(y, axis=(0, 2, 3), keepdims=True)
    var = jnp.var(y, axis=(0, 2, 3), keepdims=True)                 # biased
    y = (y - mean) * jax.lax.rsqrt(var + BN_EPS)
    y = y * gamma.reshape(1, -1, 1, 1) + beta.reshape(1, -1, 1, 1)
    y = jnp.maximum(y, 0.0)
    n, c, h, w_ = y.shape
    return y.reshape(n, c, h // 2, 2, w_ // 2, 2).max(axis=(3, 5))


if __name__ == "__main__":
    # ConvBlock(indim=4, outdim=8, pool=True, padding=1)
    N, Cin, H, W = 2, 4, 16, 16
    Cout = 8

    key = jax.random.PRNGKey(0)
    kx, kw, kb = jax.random.split(key, 3)

    x = jax.random.normal(kx, (N, Cin, H, W), dtype=jnp.float32)

    # init_layer: conv weight ~ N(0, sqrt(2 / (3*3*outdim)))
    w_std = (2.0 / float(3 * 3 * Cout)) ** 0.5
    w = w_std * jax.random.normal(kw, (Cout, Cin, 3, 3), dtype=jnp.float32)
    # conv bias: PyTorch default uniform(-1/sqrt(fan_in), 1/sqrt(fan_in)).
    # (No effect on the output: training-mode BN cancels it exactly.)
    bound = 1.0 / (Cin * 9) ** 0.5
    b = jax.random.uniform(kb, (Cout,), minval=-bound, maxval=bound,
                           dtype=jnp.float32)
    # init_layer: BN weight=1, bias=0
    gamma = jnp.ones((Cout,), dtype=jnp.float32)
    beta = jnp.zeros((Cout,), dtype=jnp.float32)

    out = jax.block_until_ready(convblock_forward(x, w, b, gamma, beta))
    assert out.shape == (N, Cout, H // 2, W // 2), out.shape

    # Strict check vs a reference that mirrors the kernel's bf16 conv math.
    ref_bf16 = reference_forward(x, w, b, gamma, beta, conv_dtype=jnp.bfloat16)
    err_bf16 = float(jnp.max(jnp.abs(out - ref_bf16)))
    assert err_bf16 < 3e-3, err_bf16

    # Looser sanity check vs the full-f32 module semantics (bf16 conv inputs
    # introduce ~1e-2 absolute deviation on O(1) normalized outputs).
    ref_f32 = reference_forward(x, w, b, gamma, beta, conv_dtype=jnp.float32)
    err_f32 = float(jnp.max(jnp.abs(out - ref_f32)))
    assert err_f32 < 5e-2, err_f32

    print("KERNEL_OK")
</pallas_src>

<mosaic_0001>
module attributes {stable_mosaic.version = 11 : i64} {
  func.func @_stats_kernel(%arg0: i32, %arg1: memref<4x1x4x89xbf16, #tpu.memory_space<vmem>>, %arg2: memref<9x8x4xbf16, #tpu.memory_space<vmem>>, %arg3: memref<1x72xf32, #tpu.memory_space<vmem>>, %arg4: memref<1x8x1xf32, #tpu.memory_space<vmem>>, %arg5: memref<1x8x1xf32, #tpu.memory_space<vmem>>) attributes {dimension_semantics = [#tpu.dimension_semantics<parallel>], iteration_bounds = array<i64: 2>, scalar_prefetch = 0 : i64, scratch_operands = 0 : i64, tpu.core_type = #tpu.core_type<tc>, window_params = [{transform_indices = @transform_0, window_bounds = array<i64: 4, 1, 4, 89>}, {pipeline_mode = #tpu.pipeline_mode<synchronous>, transform_indices = @transform_1, window_bounds = array<i64: 9, 8, 4>}, {pipeline_mode = #tpu.pipeline_mode<synchronous>, transform_indices = @transform_2, window_bounds = array<i64: 1, 72>}, {transform_indices = @transform_3, window_bounds = array<i64: 1, 8, 1>}, {transform_indices = @transform_4, window_bounds = array<i64: 1, 8, 1>}]} {
    %c0 = arith.constant 0 : index
    %c0_0 = arith.constant 0 : index
    %c0_1 = arith.constant 0 : index
    %0 = vector.load %arg2[%c0, %c0_0, %c0_1] : memref<9x8x4xbf16, #tpu.memory_space<vmem>>, vector<9x8x4xbf16>
    %c0_2 = arith.constant 0 : index
    %c0_3 = arith.constant 0 : index
    %1 = vector.load %arg3[%c0_2, %c0_3] : memref<1x72xf32, #tpu.memory_space<vmem>>, vector<1x72xf32>
    %cst = arith.constant 0.000000e+00 : f32
    %2 = vector.broadcast %cst : f32 to vector<8x1xf32>
    %cst_4 = arith.constant 0.000000e+00 : f32
    %3 = vector.broadcast %cst_4 : f32 to vector<8x1xf32>
    %c0_5 = arith.constant 0 : index
    %c0_6 = arith.constant 0 : index
    %c0_7 = arith.constant 0 : index
    %c0_8 = arith.constant 0 : index
    %4 = vector.load %arg1[%c0_5, %c0_6, %c0_7, %c0_8] : memref<4x1x4x89xbf16, #tpu.memory_space<vmem>>, vector<1x1x4x89xbf16>
    %5 = vector.shape_cast %4 : vector<1x1x4x89xbf16> to vector<4x89xbf16>
    %6 = vector.extract_strided_slice %5 {offsets = [0, 0], sizes = [4, 72], strides = [1, 1]} : vector<4x89xbf16> to vector<4x72xbf16>
    %7 = vector.extract_strided_slice %5 {offsets = [0, 1], sizes = [4, 72], strides = [1, 1]} : vector<4x89xbf16> to vector<4x72xbf16>
    %8 = vector.extract_strided_slice %5 {offsets = [0, 9], sizes = [4, 72], strides = [1, 1]} : vector<4x89xbf16> to vector<4x72xbf16>
    %9 = vector.extract_strided_slice %5 {offsets = [0, 10], sizes = [4, 72], strides = [1, 1]} : vector<4x89xbf16> to vector<4x72xbf16>
    %c1 = arith.constant 1 : index
    %c0_9 = arith.constant 0 : index
    %c0_10 = arith.constant 0 : index
    %c0_11 = arith.constant 0 : index
    %10 = vector.load %arg1[%c1, %c0_9, %c0_10, %c0_11] : memref<4x1x4x89xbf16, #tpu.memory_space<vmem>>, vector<1x1x4x89xbf16>
    %11 = vector.shape_cast %10 : vector<1x1x4x89xbf16> to vector<4x89xbf16>
    %12 = vector.extract_strided_slice %11 {offsets = [0, 0], sizes = [4, 72], strides = [1, 1]} : vector<4x89xbf16> to vector<4x72xbf16>
    %13 = vector.extract_strided_slice %11 {offsets = [0, 1], sizes = [4, 72], strides = [1, 1]} : vector<4x89xbf16> to vector<4x72xbf16>
    %14 = vector.extract_strided_slice %11 {offsets = [0, 9], sizes = [4, 72], strides = [1, 1]} : vector<4x89xbf16> to vector<4x72xbf16>
    %15 = vector.extract_strided_slice %11 {offsets = [0, 10], sizes = [4, 72], strides = [1, 1]} : vector<4x89xbf16> to vector<4x72xbf16>
    %c2 = arith.constant 2 : index
    %c0_12 = arith.constant 0 : index
    %c0_13 = arith.constant 0 : index
    %c0_14 = arith.constant 0 : index
    %16 = vector.load %arg1[%c2, %c0_12, %c0_13, %c0_14] : memref<4x1x4x89xbf16, #tpu.memory_space<vmem>>, vector<1x1x4x89xbf16>
    %17 = vector.shape_cast %16 : vector<1x1x4x89xbf16> to vector<4x89xbf16>
    %18 = vector.extract_strided_slice %17 {offsets = [0, 0], sizes = [4, 72], strides = [1, 1]} : vector<4x89xbf16> to vector<4x72xbf16>
    %19 = vector.extract_strided_slice %17 {offsets = [0, 1], sizes = [4, 72], strides = [1, 1]} : vector<4x89xbf16> to vector<4x72xbf16>
    %20 = vector.extract_strided_slice %17 {offsets = [0, 9], sizes = [4, 72], strides = [1, 1]} : vector<4x89xbf16> to vector<4x72xbf16>
    %21 = vector.extract_strided_slice %17 {offsets = [0, 10], sizes = [4, 72], strides = [1, 1]} : vector<4x89xbf16> to vector<4x72xbf16>
    %c3 = arith.constant 3 : index
    %c0_15 = arith.constant 0 : index
    %c0_16 = arith.constant 0 : index
    %c0_17 = arith.constant 0 : index
    %22 = vector.load %arg1[%c3, %c0_15, %c0_16, %c0_17] : memref<4x1x4x89xbf16, #tpu.memory_space<vmem>>, vector<1x1x4x89xbf16>
    %23 = vector.shape_cast %22 : vector<1x1x4x89xbf16> to vector<4x89xbf16>
    %24 = vector.extract_strided_slice %23 {offsets = [0, 0], sizes = [4, 72], strides = [1, 1]} : vector<4x89xbf16> to vector<4x72xbf16>
    %25 = vector.extract_strided_slice %23 {offsets = [0, 1], sizes = [4, 72], strides = [1, 1]} : vector<4x89xbf16> to vector<4x72xbf16>
    %26 = vector.extract_strided_slice %23 {offsets = [0, 9], sizes = [4, 72], strides = [1, 1]} : vector<4x89xbf16> to vector<4x72xbf16>
    %27 = vector.extract_strided_slice %23 {offsets = [0, 10], sizes = [4, 72], strides = [1, 1]} : vector<4x89xbf16> to vector<4x72xbf16>
    %cst_18 = arith.constant 0.000000e+00 : f32
    %28 = vector.broadcast %cst_18 : f32 to vector<8x72xf32>
    %29 = vector.extract_strided_slice %0 {offsets = [0, 0, 0], sizes = [1, 8, 4], strides = [1, 1, 1]} : vector<9x8x4xbf16> to vector<1x8x4xbf16>
    %30 = vector.shape_cast %29 : vector<1x8x4xbf16> to vector<8x4xbf16>
    %cst_19 = arith.constant dense<0.000000e+00> : vector<8x72xf32>
    %31 = tpu.matmul %30, %6, %cst_19 {dimension_numbers = #tpu.dot_dimension_numbers<[1], [0], [0], [1], [0, 0, 1, 1], [], []>} : vector<8x4xbf16>, vector<4x72xbf16>, vector<8x72xf32> -> vector<8x72xf32>
    %32 = arith.addf %28, %31 : vector<8x72xf32>
    %33 = vector.extract_strided_slice %0 {offsets = [1, 0, 0], sizes = [1, 8, 4], strides = [1, 1, 1]} : vector<9x8x4xbf16> to vector<1x8x4xbf16>
    %34 = vector.shape_cast %33 : vector<1x8x4xbf16> to vector<8x4xbf16>
    %cst_20 = arith.constant dense<0.000000e+00> : vector<8x72xf32>
    %35 = tpu.matmul %34, %12, %cst_20 {dimension_numbers = #tpu.dot_dimension_numbers<[1], [0], [0], [1], [0, 0, 1, 1], [], []>} : vector<8x4xbf16>, vector<4x72xbf16>, vector<8x72xf32> -> vector<8x72xf32>
    %36 = arith.addf %32, %35 : vector<8x72xf32>
    %37 = vector.extract_strided_slice %0 {offsets = [2, 0, 0], sizes = [1, 8, 4], strides = [1, 1, 1]} : vector<9x8x4xbf16> to vector<1x8x4xbf16>
    %38 = vector.shape_cast %37 : vector<1x8x4xbf16> to vector<8x4xbf16>
    %cst_21 = arith.constant dense<0.000000e+00> : vector<8x72xf32>
    %39 = tpu.matmul %38, %7, %cst_21 {dimension_numbers = #tpu.dot_dimension_numbers<[1], [0], [0], [1], [0, 0, 1, 1], [], []>} : vector<8x4xbf16>, vector<4x72xbf16>, vector<8x72xf32> -> vector<8x72xf32>
    %40 = arith.addf %36, %39 : vector<8x72xf32>
    %41 = vector.extract_strided_slice %0 {offsets = [3, 0, 0], sizes = [1, 8, 4], strides = [1, 1, 1]} : vector<9x8x4xbf16> to vector<1x8x4xbf16>
    %42 = vector.shape_cast %41 : vector<1x8x4xbf16> to vector<8x4xbf16>
    %cst_22 = arith.constant dense<0.000000e+00> : vector<8x72xf32>
    %43 = tpu.matmul %42, %18, %cst_22 {dimension_numbers = #tpu.dot_dimension_numbers<[1], [0], [0], [1], [0, 0, 1, 1], [], []>} : vector<8x4xbf16>, vector<4x72xbf16>, vector<8x72xf32> -> vector<8x72xf32>
    %44 = arith.addf %40, %43 : vector<8x72xf32>
    %45 = vector.extract_strided_slice %0 {offsets = [4, 0, 0], sizes = [1, 8, 4], strides = [1, 1, 1]} : vector<9x8x4xbf16> to vector<1x8x4xbf16>
    %46 = vector.shape_cast %45 : vector<1x8x4xbf16> to vector<8x4xbf16>
    %cst_23 = arith.constant dense<0.000000e+00> : vector<8x72xf32>
    %47 = tpu.matmul %46, %24, %cst_23 {dimension_numbers = #tpu.dot_dimension_numbers<[1], [0], [0], [1], [0, 0, 1, 1], [], []>} : vector<8x4xbf16>, vector<4x72xbf16>, vector<8x72xf32> -> vector<8x72xf32>
    %48 = arith.addf %44, %47 : vector<8x72xf32>
    %49 = vector.extract_strided_slice %0 {offsets = [5, 0, 0], sizes = [1, 8, 4], strides = [1, 1, 1]} : vector<9x8x4xbf16> to vector<1x8x4xbf16>
    %50 = vector.shape_cast %49 : vector<1x8x4xbf16> to vector<8x4xbf16>
    %cst_24 = arith.constant dense<0.000000e+00> : vector<8x72xf32>
    %51 = tpu.matmul %50, %19, %cst_24 {dimension_numbers = #tpu.dot_dimension_numbers<[1], [0], [0], [1], [0, 0, 1, 1], [], []>} : vector<8x4xbf16>, vector<4x72xbf16>, vector<8x72xf32> -> vector<8x72xf32>
    %52 = arith.addf %48, %51 : vector<8x72xf32>
    %53 = vector.extract_strided_slice %0 {offsets = [6, 0, 0], sizes = [1, 8, 4], strides = [1, 1, 1]} : vector<9x8x4xbf16> to vector<1x8x4xbf16>
    %54 = vector.shape_cast %53 : vector<1x8x4xbf16> to vector<8x4xbf16>
    %cst_25 = arith.constant dense<0.000000e+00> : vector<8x72xf32>
    %55 = tpu.matmul %54, %8, %cst_25 {dimension_numbers = #tpu.dot_dimension_numbers<[1], [0], [0], [1], [0, 0, 1, 1], [], []>} : vector<8x4xbf16>, vector<4x72xbf16>, vector<8x72xf32> -> vector<8x72xf32>
    %56 = arith.addf %52, %55 : vector<8x72xf32>
    %57 = vector.extract_strided_slice %0 {offsets = [7, 0, 0], sizes = [1, 8, 4], strides = [1, 1, 1]} : vector<9x8x4xbf16> to vector<1x8x4xbf16>
    %58 = vector.shape_cast %57 : vector<1x8x4xbf16> to vector<8x4xbf16>
    %cst_26 = arith.constant dense<0.000000e+00> : vector<8x72xf32>
    %59 = tpu.matmul %58, %14, %cst_26 {dimension_numbers = #tpu.dot_dimension_numbers<[1], [0], [0], [1], [0, 0, 1, 1], [], []>} : vector<8x4xbf16>, vector<4x72xbf16>, vector<8x72xf32> -> vector<8x72xf32>
    %60 = arith.addf %56, %59 : vector<8x72xf32>
    %61 = vector.extract_strided_slice %0 {offsets = [8, 0, 0], sizes = [1, 8, 4], strides = [1, 1, 1]} : vector<9x8x4xbf16> to vector<1x8x4xbf16>
    %62 = vector.shape_cast %61 : vector<1x8x4xbf16> to vector<8x4xbf16>
    %cst_27 = arith.constant dense<0.000000e+00> : vector<8x72xf32>
    %63 = tpu.matmul %62, %9, %cst_27 {dimension_numbers = #tpu.dot_dimension_numbers<[1], [0], [0], [1], [0, 0, 1, 1], [], []>} : vector<8x4xbf16>, vector<4x72xbf16>, vector<8x72xf32> -> vector<8x72xf32>
    %64 = arith.addf %60, %63 : vector<8x72xf32>
    %cst_28 = arith.constant 0.000000e+00 : f32
    %65 = vector.broadcast %cst_28 : f32 to vector<8x72xf32>
    %66 = vector.extract_strided_slice %0 {offsets = [0, 0, 0], sizes = [1, 8, 4], strides = [1, 1, 1]} : vector<9x8x4xbf16> to vector<1x8x4xbf16>
    %67 = vector.shape_cast %66 : vector<1x8x4xbf16> to vector<8x4xbf16>
    %cst_29 = arith.constant dense<0.000000e+00> : vector<8x72xf32>
    %68 = tpu.matmul %67, %12, %cst_29 {dimension_numbers = #tpu.dot_dimension_numbers<[1], [0], [0], [1], [0, 0, 1, 1], [], []>} : vector<8x4xbf16>, vector<4x72xbf16>, vector<8x72xf32> -> vector<8x72xf32>
    %69 = arith.addf %65, %68 : vector<8x72xf32>
    %70 = vector.extract_strided_slice %0 {offsets = [1, 0, 0], sizes = [1, 8, 4], strides = [1, 1, 1]} : vector<9x8x4xbf16> to vector<1x8x4xbf16>
    %71 = vector.shape_cast %70 : vector<1x8x4xbf16> to vector<8x4xbf16>
    %cst_30 = arith.constant dense<0.000000e+00> : vector<8x72xf32>
    %72 = tpu.matmul %71, %7, %cst_30 {dimension_numbers = #tpu.dot_dimension_numbers<[1], [0], [0], [1], [0, 0, 1, 1], [], []>} : vector<8x4xbf16>, vector<4x72xbf16>, vector<8x72xf32> -> vector<8x72xf32>
    %73 = arith.addf %69, %72 : vector<8x72xf32>
    %74 = vector.extract_strided_slice %0 {offsets = [2, 0, 0], sizes = [1, 8, 4], strides = [1, 1, 1]} : vector<9x8x4xbf16> to vector<1x8x4xbf16>
    %75 = vector.shape_cast %74 : vector<1x8x4xbf16> to vector<8x4xbf16>
    %cst_31 = arith.constant dense<0.000000e+00> : vector<8x72xf32>
    %76 = tpu.matmul %75, %13, %cst_31 {dimension_numbers = #tpu.dot_dimension_numbers<[1], [0], [0], [1], [0, 0, 1, 1], [], []>} : vector<8x4xbf16>, vector<4x72xbf16>, vector<8x72xf32> -> vector<8x72xf32>
    %77 = arith.addf %73, %76 : vector<8x72xf32>
    %78 = vector.extract_strided_slice %0 {offsets = [3, 0, 0], sizes = [1, 8, 4], strides = [1, 1, 1]} : vector<9x8x4xbf16> to vector<1x8x4xbf16>
    %79 = vector.shape_cast %78 : vector<1x8x4xbf16> to vector<8x4xbf16>
    %cst_32 = arith.constant dense<0.000000e+00> : vector<8x72xf32>
    %80 = tpu.matmul %79, %24, %cst_32 {dimension_numbers = #tpu.dot_dimension_numbers<[1], [0], [0], [1], [0, 0, 1, 1], [], []>} : vector<8x4xbf16>, vector<4x72xbf16>, vector<8x72xf32> -> vector<8x72xf32>
    %81 = arith.addf %77, %80 : vector<8x72xf32>
    %82 = vector.extract_strided_slice %0 {offsets = [4, 0, 0], sizes = [1, 8, 4], strides = [1, 1, 1]} : vector<9x8x4xbf16> to vector<1x8x4xbf16>
    %83 = vector.shape_cast %82 : vector<1x8x4xbf16> to vector<8x4xbf16>
    %cst_33 = arith.constant dense<0.000000e+00> : vector<8x72xf32>
    %84 = tpu.matmul %83, %19, %cst_33 {dimension_numbers = #tpu.dot_dimension_numbers<[1], [0], [0], [1], [0, 0, 1, 1], [], []>} : vector<8x4xbf16>, vector<4x72xbf16>, vector<8x72xf32> -> vector<8x72xf32>
    %85 = arith.addf %81, %84 : vector<8x72xf32>
    %86 = vector.extract_strided_slice %0 {offsets = [5, 0, 0], sizes = [1, 8, 4], strides = [1, 1, 1]} : vector<9x8x4xbf16> to vector<1x8x4xbf16>
    %87 = vector.shape_cast %86 : vector<1x8x4xbf16> to vector<8x4xbf16>
    %cst_34 = arith.constant dense<0.000000e+00> : vector<8x72xf32>
    %88 = tpu.matmul %87, %25, %cst_34 {dimension_numbers = #tpu.dot_dimension_numbers<[1], [0], [0], [1], [0, 0, 1, 1], [], []>} : vector<8x4xbf16>, vector<4x72xbf16>, vector<8x72xf32> -> vector<8x72xf32>
    %89 = arith.addf %85, %88 : vector<8x72xf32>
    %90 = vector.extract_strided_slice %0 {offsets = [6, 0, 0], sizes = [1, 8, 4], strides = [1, 1, 1]} : vector<9x8x4xbf16> to vector<1x8x4xbf16>
    %91 = vector.shape_cast %90 : vector<1x8x4xbf16> to vector<8x4xbf16>
    %cst_35 = arith.constant dense<0.000000e+00> : vector<8x72xf32>
    %92 = tpu.matmul %91, %14, %cst_35 {dimension_numbers = #tpu.dot_dimension_numbers<[1], [0], [0], [1], [0, 0, 1, 1], [], []>} : vector<8x4xbf16>, vector<4x72xbf16>, vector<8x72xf32> -> vector<8x72xf32>
    %93 = arith.addf %89, %92 : vector<8x72xf32>
    %94 = vector.extract_strided_slice %0 {offsets = [7, 0, 0], sizes = [1, 8, 4], strides = [1, 1, 1]} : vector<9x8x4xbf16> to vector<1x8x4xbf16>
    %95 = vector.shape_cast %94 : vector<1x8x4xbf16> to vector<8x4xbf16>
    %cst_36 = arith.constant dense<0.000000e+00> : vector<8x72xf32>
    %96 = tpu.matmul %95, %9, %cst_36 {dimension_numbers = #tpu.dot_dimension_numbers<[1], [0], [0], [1], [0, 0, 1, 1], [], []>} : vector<8x4xbf16>, vector<4x72xbf16>, vector<8x72xf32> -> vector<8x72xf32>
    %97 = arith.addf %93, %96 : vector<8x72xf32>
    %98 = vector.extract_strided_slice %0 {offsets = [8, 0, 0], sizes = [1, 8, 4], strides = [1, 1, 1]} : vector<9x8x4xbf16> to vector<1x8x4xbf16>
    %99 = vector.shape_cast %98 : vector<1x8x4xbf16> to vector<8x4xbf16>
    %cst_37 = arith.constant dense<0.000000e+00> : vector<8x72xf32>
    %100 = tpu.matmul %99, %15, %cst_37 {dimension_numbers = #tpu.dot_dimension_numbers<[1], [0], [0], [1], [0, 0, 1, 1], [], []>} : vector<8x4xbf16>, vector<4x72xbf16>, vector<8x72xf32> -> vector<8x72xf32>
    %101 = arith.addf %97, %100 : vector<8x72xf32>
    %cst_38 = arith.constant 0.000000e+00 : f32
    %102 = vector.broadcast %cst_38 : f32 to vector<8x72xf32>
    %103 = vector.extract_strided_slice %0 {offsets = [0, 0, 0], sizes = [1, 8, 4], strides = [1, 1, 1]} : vector<9x8x4xbf16> to vector<1x8x4xbf16>
    %104 = vector.shape_cast %103 : vector<1x8x4xbf16> to vector<8x4xbf16>
    %cst_39 = arith.constant dense<0.000000e+00> : vector<8x72xf32>
    %105 = tpu.matmul %104, %18, %cst_39 {dimension_numbers = #tpu.dot_dimension_numbers<[1], [0], [0], [1], [0, 0, 1, 1], [], []>} : vector<8x4xbf16>, vector<4x72xbf16>, vector<8x72xf32> -> vector<8x72xf32>
    %106 = arith.addf %102, %105 : vector<8x72xf32>
    %107 = vector.extract_strided_slice %0 {offsets = [1, 0, 0], sizes = [1, 8, 4], strides = [1, 1, 1]} : vector<9x8x4xbf16> to vector<1x8x4xbf16>
    %108 = vector.shape_cast %107 : vector<1x8x4xbf16> to vector<8x4xbf16>
    %cst_40 = arith.constant dense<0.000000e+00> : vector<8x72xf32>
    %109 = tpu.matmul %108, %24, %cst_40 {dimension_numbers = #tpu.dot_dimension_numbers<[1], [0], [0], [1], [0, 0, 1, 1], [], []>} : vector<8x4xbf16>, vector<4x72xbf16>, vector<8x72xf32> -> vector<8x72xf32>
    %110 = arith.addf %106, %109 : vector<8x72xf32>
    %111 = vector.extract_strided_slice %0 {offsets = [2, 0, 0], sizes = [1, 8, 4], strides = [1, 1, 1]} : vector<9x8x4xbf16> to vector<1x8x4xbf16>
    %112 = vector.shape_cast %111 : vector<1x8x4xbf16> to vector<8x4xbf16>
    %cst_41 = arith.constant dense<0.000000e+00> : vector<8x72xf32>
    %113 = tpu.matmul %112, %19, %cst_41 {dimension_numbers = #tpu.dot_dimension_numbers<[1], [0], [0], [1], [0, 0, 1, 1], [], []>} : vector<8x4xbf16>, vector<4x72xbf16>, vector<8x72xf32> -> vector<8x72xf32>
    %114 = arith.addf %110, %113 : vector<8x72xf32>
    %115 = vector.extract_strided_slice %0 {offsets = [3, 0, 0], sizes = [1, 8, 4], strides = [1, 1, 1]} : vector<9x8x4xbf16> to vector<1x8x4xbf16>
    %116 = vector.shape_cast %115 : vector<1x8x4xbf16> to vector<8x4xbf16>
    %cst_42 = arith.constant dense<0.000000e+00> : vector<8x72xf32>
    %117 = tpu.matmul %116, %8, %cst_42 {dimension_numbers = #tpu.dot_dimension_numbers<[1], [0], [0], [1], [0, 0, 1, 1], [], []>} : vector<8x4xbf16>, vector<4x72xbf16>, vector<8x72xf32> -> vector<8x72xf32>
    %118 = arith.addf %114, %117 : vector<8x72xf32>
    %119 = vector.extract_strided_slice %0 {offsets = [4, 0, 0], sizes = [1, 8, 4], strides = [1, 1, 1]} : vector<9x8x4xbf16> to vector<1x8x4xbf16>
    %120 = vector.shape_cast %119 : vector<1x8x4xbf16> to vector<8x4xbf16>
    %cst_43 = arith.constant dense<0.000000e+00> : vector<8x72xf32>
    %121 = tpu.matmul %120, %14, %cst_43 {dimension_numbers = #tpu.dot_dimension_numbers<[1], [0], [0], [1], [0, 0, 1, 1], [], []>} : vector<8x4xbf16>, vector<4x72xbf16>, vector<8x72xf32> -> vector<8x72xf32>
    %122 = arith.addf %118, %121 : vector<8x72xf32>
    %123 = vector.extract_strided_slice %0 {offsets = [5, 0, 0], sizes = [1, 8, 4], strides = [1, 1, 1]} : vector<9x8x4xbf16> to vector<1x8x4xbf16>
    %124 = vector.shape_cast %123 : vector<1x8x4xbf16> to vector<8x4xbf16>
    %cst_44 = arith.constant dense<0.000000e+00> : vector<8x72xf32>
    %125 = tpu.matmul %124, %9, %cst_44 {dimension_numbers = #tpu.dot_dimension_numbers<[1], [0], [0], [1], [0, 0, 1, 1], [], []>} : vector<8x4xbf16>, vector<4x72xbf16>, vector<8x72xf32> -> vector<8x72xf32>
    %126 = arith.addf %122, %125 : vector<8x72xf32>
    %127 = vector.extract_strided_slice %0 {offsets = [6, 0, 0], sizes = [1, 8, 4], strides = [1, 1, 1]} : vector<9x8x4xbf16> to vector<1x8x4xbf16>
    %128 = vector.shape_cast %127 : vector<1x8x4xbf16> to vector<8x4xbf16>
    %cst_45 = arith.constant dense<0.000000e+00> : vector<8x72xf32>
    %129 = tpu.matmul %128, %20, %cst_45 {dimension_numbers = #tpu.dot_dimension_numbers<[1], [0], [0], [1], [0, 0, 1, 1], [], []>} : vector<8x4xbf16>, vector<4x72xbf16>, vector<8x72xf32> -> vector<8x72xf32>
    %130 = arith.addf %126, %129 : vector<8x72xf32>
    %131 = vector.extract_strided_slice %0 {offsets = [7, 0, 0], sizes = [1, 8, 4], strides = [1, 1, 1]} : vector<9x8x4xbf16> to vector<1x8x4xbf16>
    %132 = vector.shape_cast %131 : vector<1x8x4xbf16> to vector<8x4xbf16>
    %cst_46 = arith.constant dense<0.000000e+00> : vector<8x72xf32>
    %133 = tpu.matmul %132, %26, %cst_46 {dimension_numbers = #tpu.dot_dimension_numbers<[1], [0], [0], [1], [0, 0, 1, 1], [], []>} : vector<8x4xbf16>, vector<4x72xbf16>, vector<8x72xf32> -> vector<8x72xf32>
    %134 = arith.addf %130, %133 : vector<8x72xf32>
    %135 = vector.extract_strided_slice %0 {offsets = [8, 0, 0], sizes = [1, 8, 4], strides = [1, 1, 1]} : vector<9x8x4xbf16> to vector<1x8x4xbf16>
    %136 = vector.shape_cast %135 : vector<1x8x4xbf16> to vector<8x4xbf16>
    %cst_47 = arith.constant dense<0.000000e+00> : vector<8x72xf32>
    %137 = tpu.matmul %136, %21, %cst_47 {dimension_numbers = #tpu.dot_dimension_numbers<[1], [0], [0], [1], [0, 0, 1, 1], [], []>} : vector<8x4xbf16>, vector<4x72xbf16>, vector<8x72xf32> -> vector<8x72xf32>
    %138 = arith.addf %134, %137 : vector<8x72xf32>
    %cst_48 = arith.constant 0.000000e+00 : f32
    %139 = vector.broadcast %cst_48 : f32 to vector<8x72xf32>
    %140 = vector.extract_strided_slice %0 {offsets = [0, 0, 0], sizes = [1, 8, 4], strides = [1, 1, 1]} : vector<9x8x4xbf16> to vector<1x8x4xbf16>
    %141 = vector.shape_cast %140 : vector<1x8x4xbf16> to vector<8x4xbf16>
    %cst_49 = arith.constant dense<0.000000e+00> : vector<8x72xf32>
    %142 = tpu.matmul %141, %24, %cst_49 {dimension_numbers = #tpu.dot_dimension_numbers<[1], [0], [0], [1], [0, 0, 1, 1], [], []>} : vector<8x4xbf16>, vector<4x72xbf16>, vector<8x72xf32> -> vector<8x72xf32>
    %143 = arith.addf %139, %142 : vector<8x72xf32>
    %144 = vector.extract_strided_slice %0 {offsets = [1, 0, 0], sizes = [1, 8, 4], strides = [1, 1, 1]} : vector<9x8x4xbf16> to vector<1x8x4xbf16>
    %145 = vector.shape_cast %144 : vector<1x8x4xbf16> to vector<8x4xbf16>
    %cst_50 = arith.constant dense<0.000000e+00> : vector<8x72xf32>
    %146 = tpu.matmul %145, %19, %cst_50 {dimension_numbers = #tpu.dot_dimension_numbers<[1], [0], [0], [1], [0, 0, 1, 1], [], []>} : vector<8x4xbf16>, vector<4x72xbf16>, vector<8x72xf32> -> vector<8x72xf32>
    %147 = arith.addf %143, %146 : vector<8x72xf32>
    %148 = vector.extract_strided_slice %0 {offsets = [2, 0, 0], sizes = [1, 8, 4], strides = [1, 1, 1]} : vector<9x8x4xbf16> to vector<1x8x4xbf16>
    %149 = vector.shape_cast %148 : vector<1x8x4xbf16> to vector<8x4xbf16>
    %cst_51 = arith.constant dense<0.000000e+00> : vector<8x72xf32>
    %150 = tpu.matmul %149, %25, %cst_51 {dimension_numbers = #tpu.dot_dimension_numbers<[1], [0], [0], [1], [0, 0, 1, 1], [], []>} : vector<8x4xbf16>, vector<4x72xbf16>, vector<8x72xf32> -> vector<8x72xf32>
    %151 = arith.addf %147, %150 : vector<8x72xf32>
    %152 = vector.extract_strided_slice %0 {offsets = [3, 0, 0], sizes = [1, 8, 4], strides = [1, 1, 1]} : vector<9x8x4xbf16> to vector<1x8x4xbf16>
    %153 = vector.shape_cast %152 : vector<1x8x4xbf16> to vector<8x4xbf16>
    %cst_52 = arith.constant dense<0.000000e+00> : vector<8x72xf32>
    %154 = tpu.matmul %153, %14, %cst_52 {dimension_numbers = #tpu.dot_dimension_numbers<[1], [0], [0], [1], [0, 0, 1, 1], [], []>} : vector<8x4xbf16>, vector<4x72xbf16>, vector<8x72xf32> -> vector<8x72xf32>
    %155 = arith.addf %151, %154 : vector<8x72xf32>
    %156 = vector.extract_strided_slice %0 {offsets = [4, 0, 0], sizes = [1, 8, 4], strides = [1, 1, 1]} : vector<9x8x4xbf16> to vector<1x8x4xbf16>
    %157 = vector.shape_cast %156 : vector<1x8x4xbf16> to vector<8x4xbf16>
    %cst_53 = arith.constant dense<0.000000e+00> : vector<8x72xf32>
    %158 = tpu.matmul %157, %9, %cst_53 {dimension_numbers = #tpu.dot_dimension_numbers<[1], [0], [0], [1], [0, 0, 1, 1], [], []>} : vector<8x4xbf16>, vector<4x72xbf16>, vector<8x72xf32> -> vector<8x72xf32>
    %159 = arith.addf %155, %158 : vector<8x72xf32>
    %160 = vector.extract_strided_slice %0 {offsets = [5, 0, 0], sizes = [1, 8, 4], strides = [1, 1, 1]} : vector<9x8x4xbf16> to vector<1x8x4xbf16>
    %161 = vector.shape_cast %160 : vector<1x8x4xbf16> to vector<8x4xbf16>
    %cst_54 = arith.constant dense<0.000000e+00> : vector<8x72xf32>
    %162 = tpu.matmul %161, %15, %cst_54 {dimension_numbers = #tpu.dot_dimension_numbers<[1], [0], [0], [1], [0, 0, 1, 1], [], []>} : vector<8x4xbf16>, vector<4x72xbf16>, vector<8x72xf32> -> vector<8x72xf32>
    %163 = arith.addf %159, %162 : vector<8x72xf32>
    %164 = vector.extract_strided_slice %0 {offsets = [6, 0, 0], sizes = [1, 8, 4], strides = [1, 1, 1]} : vector<9x8x4xbf16> to vector<1x8x4xbf16>
    %165 = vector.shape_cast %164 : vector<1x8x4xbf16> to vector<8x4xbf16>
    %cst_55 = arith.constant dense<0.000000e+00> : vector<8x72xf32>
    %166 = tpu.matmul %165, %26, %cst_55 {dimension_numbers = #tpu.dot_dimension_numbers<[1], [0], [0], [1], [0, 0, 1, 1], [], []>} : vector<8x4xbf16>, vector<4x72xbf16>, vector<8x72xf32> -> vector<8x72xf32>
    %167 = arith.addf %163, %166 : vector<8x72xf32>
    %168 = vector.extract_strided_slice %0 {offsets = [7, 0, 0], sizes = [1, 8, 4], strides = [1, 1, 1]} : vector<9x8x4xbf16> to vector<1x8x4xbf16>
    %169 = vector.shape_cast %168 : vector<1x8x4xbf16> to vector<8x4xbf16>
    %cst_56 = arith.constant dense<0.000000e+00> : vector<8x72xf32>
    %170 = tpu.matmul %169, %21, %cst_56 {dimension_numbers = #tpu.dot_dimension_numbers<[1], [0], [0], [1], [0, 0, 1, 1], [], []>} : vector<8x4xbf16>, vector<4x72xbf16>, vector<8x72xf32> -> vector<8x72xf32>
    %171 = arith.addf %167, %170 : vector<8x72xf32>
    %172 = vector.extract_strided_slice %0 {offsets = [8, 0, 0], sizes = [1, 8, 4], strides = [1, 1, 1]} : vector<9x8x4xbf16> to vector<1x8x4xbf16>
    %173 = vector.shape_cast %172 : vector<1x8x4xbf16> to vector<8x4xbf16>
    %cst_57 = arith.constant dense<0.000000e+00> : vector<8x72xf32>
    %174 = tpu.matmul %173, %27, %cst_57 {dimension_numbers = #tpu.dot_dimension_numbers<[1], [0], [0], [1], [0, 0, 1, 1], [], []>} : vector<8x4xbf16>, vector<4x72xbf16>, vector<8x72xf32> -> vector<8x72xf32>
    %175 = arith.addf %171, %174 : vector<8x72xf32>
    %176 = vector.broadcast %1 : vector<1x72xf32> to vector<8x72xf32>
    %177 = arith.mulf %64, %176 : vector<8x72xf32>
    %cst_58 = arith.constant dense<0.000000e+00> : vector<8xf32>
    %178 = vector.multi_reduction <add>, %177, %cst_58 [1] : vector<8x72xf32> to vector<8xf32>
    %179 = vector.shape_cast %178 : vector<8xf32> to vector<8x1xf32>
    %180 = arith.addf %2, %179 : vector<8x1xf32>
    %181 = arith.mulf %177, %64 : vector<8x72xf32>
    %cst_59 = arith.constant dense<0.000000e+00> : vector<8xf32>
    %182 = vector.multi_reduction <add>, %181, %cst_59 [1] : vector<8x72xf32> to vector<8xf32>
    %183 = vector.shape_cast %182 : vector<8xf32> to vector<8x1xf32>
    %184 = arith.addf %3, %183 : vector<8x1xf32>
    %185 = vector.broadcast %1 : vector<1x72xf32> to vector<8x72xf32>
    %186 = arith.mulf %101, %185 : vector<8x72xf32>
    %cst_60 = arith.constant dense<0.000000e+00> : vector<8xf32>
    %187 = vector.multi_reduction <add>, %186, %cst_60 [1] : vector<8x72xf32> to vector<8xf32>
    %188 = vector.shape_cast %187 : vector<8xf32> to vector<8x1xf32>
    %189 = arith.addf %180, %188 : vector<8x1xf32>
    %190 = arith.mulf %186, %101 : vector<8x72xf32>
    %cst_61 = arith.constant dense<0.000000e+00> : vector<8xf32>
    %191 = vector.multi_reduction <add>, %190, %cst_61 [1] : vector<8x72xf32> to vector<8xf32>
    %192 = vector.shape_cast %191 : vector<8xf32> to vector<8x1xf32>
    %193 = arith.addf %184, %192 : vector<8x1xf32>
    %194 = vector.broadcast %1 : vector<1x72xf32> to vector<8x72xf32>
    %195 = arith.mulf %138, %194 : vector<8x72xf32>
    %cst_62 = arith.constant dense<0.000000e+00> : vector<8xf32>
    %196 = vector.multi_reduction <add>, %195, %cst_62 [1] : vector<8x72xf32> to vector<8xf32>
    %197 = vector.shape_cast %196 : vector<8xf32> to vector<8x1xf32>
    %198 = arith.addf %189, %197 : vector<8x1xf32>
    %199 = arith.mulf %195, %138 : vector<8x72xf32>
    %cst_63 = arith.constant dense<0.000000e+00> : vector<8xf32>
    %200 = vector.multi_reduction <add>, %199, %cst_63 [1] : vector<8x72xf32> to vector<8xf32>
    %201 = vector.shape_cast %200 : vector<8xf32> to vector<8x1xf32>
    %202 = arith.addf %193, %201 : vector<8x1xf32>
    %203 = vector.broadcast %1 : vector<1x72xf32> to vector<8x72xf32>
    %204 = arith.mulf %175, %203 : vector<8x72xf32>
    %cst_64 = arith.constant dense<0.000000e+00> : vector<8xf32>
    %205 = vector.multi_reduction <add>, %204, %cst_64 [1] : vector<8x72xf32> to vector<8xf32>
    %206 = vector.shape_cast %205 : vector<8xf32> to vector<8x1xf32>
    %207 = arith.addf %198, %206 : vector<8x1xf32>
    %208 = arith.mulf %204, %175 : vector<8x72xf32>
    %cst_65 = arith.constant dense<0.000000e+00> : vector<8xf32>
    %209 = vector.multi_reduction <add>, %208, %cst_65 [1] : vector<8x72xf32> to vector<8xf32>
    %210 = vector.shape_cast %209 : vector<8xf32> to vector<8x1xf32>
    %211 = arith.addf %202, %210 : vector<8x1xf32>
    %c0_66 = arith.constant 0 : index
    %c0_67 = arith.constant 0 : index
    %c0_68 = arith.constant 0 : index
    %212 = vector.load %arg4[%c0_66, %c0_67, %c0_68] : memref<1x8x1xf32, #tpu.memory_space<vmem>>, vector<1x8x1xf32>
    %213 = vector.shape_cast %212 : vector<1x8x1xf32> to vector<8x1xf32>
    %214 = vector.shape_cast %207 : vector<8x1xf32> to vector<1x8x1xf32>
    tpu.vector_store %arg4[%c0_66, %c0_67, %c0_68], %214 {strides = array<i32>} : memref<1x8x1xf32, #tpu.memory_space<vmem>>, vector<1x8x1xf32>,
    %c0_69 = arith.constant 0 : index
    %c0_70 = arith.constant 0 : index
    %c0_71 = arith.constant 0 : index
    %215 = vector.load %arg5[%c0_69, %c0_70, %c0_71] : memref<1x8x1xf32, #tpu.memory_space<vmem>>, vector<1x8x1xf32>
    %216 = vector.shape_cast %215 : vector<1x8x1xf32> to vector<8x1xf32>
    %217 = vector.shape_cast %211 : vector<8x1xf32> to vector<1x8x1xf32>
    tpu.vector_store %arg5[%c0_69, %c0_70, %c0_71], %217 {strides = array<i32>} : memref<1x8x1xf32, #tpu.memory_space<vmem>>, vector<1x8x1xf32>,
    return
  }
  func.func @transform_0(%arg0: i32) -> (i32, i32, i32, i32) {
    %c0_i32 = arith.constant 0 : i32
    %c0_i32_0 = arith.constant 0 : i32
    %c0_i32_1 = arith.constant 0 : i32
    %c0_i32_2 = arith.constant 0 : i32
    return %c0_i32, %arg0, %c0_i32_0, %c0_i32_1 : i32, i32, i32, i32
  }
  func.func @transform_1(%arg0: i32) -> (i32, i32, i32) {
    %c0_i32 = arith.constant 0 : i32
    %c0_i32_0 = arith.constant 0 : i32
    %c0_i32_1 = arith.constant 0 : i32
    %c0_i32_2 = arith.constant 0 : i32
    return %c0_i32, %c0_i32_0, %c0_i32_1 : i32, i32, i32
  }
  func.func @transform_2(%arg0: i32) -> (i32, i32) {
    %c0_i32 = arith.constant 0 : i32
    %c0_i32_0 = arith.constant 0 : i32
    %c0_i32_1 = arith.constant 0 : i32
    return %c0_i32, %c0_i32_0 : i32, i32
  }
  func.func @transform_3(%arg0: i32) -> (i32, i32, i32) {
    %c0_i32 = arith.constant 0 : i32
    %c0_i32_0 = arith.constant 0 : i32
    %c0_i32_1 = arith.constant 0 : i32
    return %arg0, %c0_i32, %c0_i32_0 : i32, i32, i32
  }
  func.func @transform_4(%arg0: i32) -> (i32, i32, i32) {
    %c0_i32 = arith.constant 0 : i32
    %c0_i32_0 = arith.constant 0 : i32
    %c0_i32_1 = arith.constant 0 : i32
    return %arg0, %c0_i32, %c0_i32_0 : i32, i32, i32
  }
}

module attributes {stable_mosaic.version = 11 : i64} {
  func.func @_bn_relu_pool_kernel(%arg0: i32, %arg1: memref<4x1x4x89xbf16, #tpu.memory_space<vmem>>, %arg2: memref<9x8x4xbf16, #tpu.memory_space<vmem>>, %arg3: memref<8x1xf32, #tpu.memory_space<vmem>>, %arg4: memref<8x1xf32, #tpu.memory_space<vmem>>, %arg5: memref<1x8x72xf32, #tpu.memory_space<vmem>>) attributes {dimension_semantics = [#tpu.dimension_semantics<parallel>], iteration_bounds = array<i64: 2>, scalar_prefetch = 0 : i64, scratch_operands = 0 : i64, tpu.core_type = #tpu.core_type<tc>, window_params = [{transform_indices = @transform_0, window_bounds = array<i64: 4, 1, 4, 89>}, {pipeline_mode = #tpu.pipeline_mode<synchronous>, transform_indices = @transform_1, window_bounds = array<i64: 9, 8, 4>}, {pipeline_mode = #tpu.pipeline_mode<synchronous>, transform_indices = @transform_2, window_bounds = array<i64: 8, 1>}, {pipeline_mode = #tpu.pipeline_mode<synchronous>, transform_indices = @transform_3, window_bounds = array<i64: 8, 1>}, {transform_indices = @transform_4, window_bounds = array<i64: 1, 8, 72>}]} {
    %c0 = arith.constant 0 : index
    %c0_0 = arith.constant 0 : index
    %c0_1 = arith.constant 0 : index
    %0 = vector.load %arg2[%c0, %c0_0, %c0_1] : memref<9x8x4xbf16, #tpu.memory_space<vmem>>, vector<9x8x4xbf16>
    %c0_2 = arith.constant 0 : index
    %c0_3 = arith.constant 0 : index
    %1 = vector.load %arg3[%c0_2, %c0_3] : memref<8x1xf32, #tpu.memory_space<vmem>>, vector<8x1xf32>
    %2 = vector.shape_cast %1 : vector<8x1xf32> to vector<8x1xf32>
    %3 = vector.broadcast %2 : vector<8x1xf32> to vector<8x72xf32>
    %c0_4 = arith.constant 0 : index
    %c0_5 = arith.constant 0 : index
    %4 = vector.load %arg4[%c0_4, %c0_5] : memref<8x1xf32, #tpu.memory_space<vmem>>, vector<8x1xf32>
    %5 = vector.shape_cast %4 : vector<8x1xf32> to vector<8x1xf32>
    %6 = vector.broadcast %5 : vector<8x1xf32> to vector<8x72xf32>
    %c0_6 = arith.constant 0 : index
    %c0_7 = arith.constant 0 : index
    %c0_8 = arith.constant 0 : index
    %c0_9 = arith.constant 0 : index
    %7 = vector.load %arg1[%c0_6, %c0_7, %c0_8, %c0_9] : memref<4x1x4x89xbf16, #tpu.memory_space<vmem>>, vector<1x1x4x89xbf16>
    %8 = vector.shape_cast %7 : vector<1x1x4x89xbf16> to vector<4x89xbf16>
    %9 = vector.extract_strided_slice %8 {offsets = [0, 0], sizes = [4, 72], strides = [1, 1]} : vector<4x89xbf16> to vector<4x72xbf16>
    %10 = vector.extract_strided_slice %8 {offsets = [0, 1], sizes = [4, 72], strides = [1, 1]} : vector<4x89xbf16> to vector<4x72xbf16>
    %11 = vector.extract_strided_slice %8 {offsets = [0, 9], sizes = [4, 72], strides = [1, 1]} : vector<4x89xbf16> to vector<4x72xbf16>
    %12 = vector.extract_strided_slice %8 {offsets = [0, 10], sizes = [4, 72], strides = [1, 1]} : vector<4x89xbf16> to vector<4x72xbf16>
    %c1 = arith.constant 1 : index
    %c0_10 = arith.constant 0 : index
    %c0_11 = arith.constant 0 : index
    %c0_12 = arith.constant 0 : index
    %13 = vector.load %arg1[%c1, %c0_10, %c0_11, %c0_12] : memref<4x1x4x89xbf16, #tpu.memory_space<vmem>>, vector<1x1x4x89xbf16>
    %14 = vector.shape_cast %13 : vector<1x1x4x89xbf16> to vector<4x89xbf16>
    %15 = vector.extract_strided_slice %14 {offsets = [0, 0], sizes = [4, 72], strides = [1, 1]} : vector<4x89xbf16> to vector<4x72xbf16>
    %16 = vector.extract_strided_slice %14 {offsets = [0, 1], sizes = [4, 72], strides = [1, 1]} : vector<4x89xbf16> to vector<4x72xbf16>
    %17 = vector.extract_strided_slice %14 {offsets = [0, 9], sizes = [4, 72], strides = [1, 1]} : vector<4x89xbf16> to vector<4x72xbf16>
    %18 = vector.extract_strided_slice %14 {offsets = [0, 10], sizes = [4, 72], strides = [1, 1]} : vector<4x89xbf16> to vector<4x72xbf16>
    %c2 = arith.constant 2 : index
    %c0_13 = arith.constant 0 : index
    %c0_14 = arith.constant 0 : index
    %c0_15 = arith.constant 0 : index
    %19 = vector.load %arg1[%c2, %c0_13, %c0_14, %c0_15] : memref<4x1x4x89xbf16, #tpu.memory_space<vmem>>, vector<1x1x4x89xbf16>
    %20 = vector.shape_cast %19 : vector<1x1x4x89xbf16> to vector<4x89xbf16>
    %21 = vector.extract_strided_slice %20 {offsets = [0, 0], sizes = [4, 72], strides = [1, 1]} : vector<4x89xbf16> to vector<4x72xbf16>
    %22 = vector.extract_strided_slice %20 {offsets = [0, 1], sizes = [4, 72], strides = [1, 1]} : vector<4x89xbf16> to vector<4x72xbf16>
    %23 = vector.extract_strided_slice %20 {offsets = [0, 9], sizes = [4, 72], strides = [1, 1]} : vector<4x89xbf16> to vector<4x72xbf16>
    %24 = vector.extract_strided_slice %20 {offsets = [0, 10], sizes = [4, 72], strides = [1, 1]} : vector<4x89xbf16> to vector<4x72xbf16>
    %c3 = arith.constant 3 : index
    %c0_16 = arith.constant 0 : index
    %c0_17 = arith.constant 0 : index
    %c0_18 = arith.constant 0 : index
    %25 = vector.load %arg1[%c3, %c0_16, %c0_17, %c0_18] : memref<4x1x4x89xbf16, #tpu.memory_space<vmem>>, vector<1x1x4x89xbf16>
    %26 = vector.shape_cast %25 : vector<1x1x4x89xbf16> to vector<4x89xbf16>
    %27 = vector.extract_strided_slice %26 {offsets = [0, 0], sizes = [4, 72], strides = [1, 1]} : vector<4x89xbf16> to vector<4x72xbf16>
    %28 = vector.extract_strided_slice %26 {offsets = [0, 1], sizes = [4, 72], strides = [1, 1]} : vector<4x89xbf16> to vector<4x72xbf16>
    %29 = vector.extract_strided_slice %26 {offsets = [0, 9], sizes = [4, 72], strides = [1, 1]} : vector<4x89xbf16> to vector<4x72xbf16>
    %30 = vector.extract_strided_slice %26 {offsets = [0, 10], sizes = [4, 72], strides = [1, 1]} : vector<4x89xbf16> to vector<4x72xbf16>
    %cst = arith.constant 0.000000e+00 : f32
    %31 = vector.broadcast %cst : f32 to vector<8x72xf32>
    %32 = vector.extract_strided_slice %0 {offsets = [0, 0, 0], sizes = [1, 8, 4], strides = [1, 1, 1]} : vector<9x8x4xbf16> to vector<1x8x4xbf16>
    %33 = vector.shape_cast %32 : vector<1x8x4xbf16> to vector<8x4xbf16>
    %cst_19 = arith.constant dense<0.000000e+00> : vector<8x72xf32>
    %34 = tpu.matmul %33, %9, %cst_19 {dimension_numbers = #tpu.dot_dimension_numbers<[1], [0], [0], [1], [0, 0, 1, 1], [], []>} : vector<8x4xbf16>, vector<4x72xbf16>, vector<8x72xf32> -> vector<8x72xf32>
    %35 = arith.addf %31, %34 : vector<8x72xf32>
    %36 = vector.extract_strided_slice %0 {offsets = [1, 0, 0], sizes = [1, 8, 4], strides = [1, 1, 1]} : vector<9x8x4xbf16> to vector<1x8x4xbf16>
    %37 = vector.shape_cast %36 : vector<1x8x4xbf16> to vector<8x4xbf16>
    %cst_20 = arith.constant dense<0.000000e+00> : vector<8x72xf32>
    %38 = tpu.matmul %37, %15, %cst_20 {dimension_numbers = #tpu.dot_dimension_numbers<[1], [0], [0], [1], [0, 0, 1, 1], [], []>} : vector<8x4xbf16>, vector<4x72xbf16>, vector<8x72xf32> -> vector<8x72xf32>
    %39 = arith.addf %35, %38 : vector<8x72xf32>
    %40 = vector.extract_strided_slice %0 {offsets = [2, 0, 0], sizes = [1, 8, 4], strides = [1, 1, 1]} : vector<9x8x4xbf16> to vector<1x8x4xbf16>
    %41 = vector.shape_cast %40 : vector<1x8x4xbf16> to vector<8x4xbf16>
    %cst_21 = arith.constant dense<0.000000e+00> : vector<8x72xf32>
    %42 = tpu.matmul %41, %10, %cst_21 {dimension_numbers = #tpu.dot_dimension_numbers<[1], [0], [0], [1], [0, 0, 1, 1], [], []>} : vector<8x4xbf16>, vector<4x72xbf16>, vector<8x72xf32> -> vector<8x72xf32>
    %43 = arith.addf %39, %42 : vector<8x72xf32>
    %44 = vector.extract_strided_slice %0 {offsets = [3, 0, 0], sizes = [1, 8, 4], strides = [1, 1, 1]} : vector<9x8x4xbf16> to vector<1x8x4xbf16>
    %45 = vector.shape_cast %44 : vector<1x8x4xbf16> to vector<8x4xbf16>
    %cst_22 = arith.constant dense<0.000000e+00> : vector<8x72xf32>
    %46 = tpu.matmul %45, %21, %cst_22 {dimension_numbers = #tpu.dot_dimension_numbers<[1], [0], [0], [1], [0, 0, 1, 1], [], []>} : vector<8x4xbf16>, vector<4x72xbf16>, vector<8x72xf32> -> vector<8x72xf32>
    %47 = arith.addf %43, %46 : vector<8x72xf32>
    %48 = vector.extract_strided_slice %0 {offsets = [4, 0, 0], sizes = [1, 8, 4], strides = [1, 1, 1]} : vector<9x8x4xbf16> to vector<1x8x4xbf16>
    %49 = vector.shape_cast %48 : vector<1x8x4xbf16> to vector<8x4xbf16>
    %cst_23 = arith.constant dense<0.000000e+00> : vector<8x72xf32>
    %50 = tpu.matmul %49, %27, %cst_23 {dimension_numbers = #tpu.dot_dimension_numbers<[1], [0], [0], [1], [0, 0, 1, 1], [], []>} : vector<8x4xbf16>, vector<4x72xbf16>, vector<8x72xf32> -> vector<8x72xf32>
    %51 = arith.addf %47, %50 : vector<8x72xf32>
    %52 = vector.extract_strided_slice %0 {offsets = [5, 0, 0], sizes = [1, 8, 4], strides = [1, 1, 1]} : vector<9x8x4xbf16> to vector<1x8x4xbf16>
    %53 = vector.shape_cast %52 : vector<1x8x4xbf16> to vector<8x4xbf16>
    %cst_24 = arith.constant dense<0.000000e+00> : vector<8x72xf32>
    %54 = tpu.matmul %53, %22, %cst_24 {dimension_numbers = #tpu.dot_dimension_numbers<[1], [0], [0], [1], [0, 0, 1, 1], [], []>} : vector<8x4xbf16>, vector<4x72xbf16>, vector<8x72xf32> -> vector<8x72xf32>
    %55 = arith.addf %51, %54 : vector<8x72xf32>
    %56 = vector.extract_strided_slice %0 {offsets = [6, 0, 0], sizes = [1, 8, 4], strides = [1, 1, 1]} : vector<9x8x4xbf16> to vector<1x8x4xbf16>
    %57 = vector.shape_cast %56 : vector<1x8x4xbf16> to vector<8x4xbf16>
    %cst_25 = arith.constant dense<0.000000e+00> : vector<8x72xf32>
    %58 = tpu.matmul %57, %11, %cst_25 {dimension_numbers = #tpu.dot_dimension_numbers<[1], [0], [0], [1], [0, 0, 1, 1], [], []>} : vector<8x4xbf16>, vector<4x72xbf16>, vector<8x72xf32> -> vector<8x72xf32>
    %59 = arith.addf %55, %58 : vector<8x72xf32>
    %60 = vector.extract_strided_slice %0 {offsets = [7, 0, 0], sizes = [1, 8, 4], strides = [1, 1, 1]} : vector<9x8x4xbf16> to vector<1x8x4xbf16>
    %61 = vector.shape_cast %60 : vector<1x8x4xbf16> to vector<8x4xbf16>
    %cst_26 = arith.constant dense<0.000000e+00> : vector<8x72xf32>
    %62 = tpu.matmul %61, %17, %cst_26 {dimension_numbers = #tpu.dot_dimension_numbers<[1], [0], [0], [1], [0, 0, 1, 1], [], []>} : vector<8x4xbf16>, vector<4x72xbf16>, vector<8x72xf32> -> vector<8x72xf32>
    %63 = arith.addf %59, %62 : vector<8x72xf32>
    %64 = vector.extract_strided_slice %0 {offsets = [8, 0, 0], sizes = [1, 8, 4], strides = [1, 1, 1]} : vector<9x8x4xbf16> to vector<1x8x4xbf16>
    %65 = vector.shape_cast %64 : vector<1x8x4xbf16> to vector<8x4xbf16>
    %cst_27 = arith.constant dense<0.000000e+00> : vector<8x72xf32>
    %66 = tpu.matmul %65, %12, %cst_27 {dimension_numbers = #tpu.dot_dimension_numbers<[1], [0], [0], [1], [0, 0, 1, 1], [], []>} : vector<8x4xbf16>, vector<4x72xbf16>, vector<8x72xf32> -> vector<8x72xf32>
    %67 = arith.addf %63, %66 : vector<8x72xf32>
    %cst_28 = arith.constant 0.000000e+00 : f32
    %68 = vector.broadcast %cst_28 : f32 to vector<8x72xf32>
    %69 = vector.extract_strided_slice %0 {offsets = [0, 0, 0], sizes = [1, 8, 4], strides = [1, 1, 1]} : vector<9x8x4xbf16> to vector<1x8x4xbf16>
    %70 = vector.shape_cast %69 : vector<1x8x4xbf16> to vector<8x4xbf16>
    %cst_29 = arith.constant dense<0.000000e+00> : vector<8x72xf32>
    %71 = tpu.matmul %70, %15, %cst_29 {dimension_numbers = #tpu.dot_dimension_numbers<[1], [0], [0], [1], [0, 0, 1, 1], [], []>} : vector<8x4xbf16>, vector<4x72xbf16>, vector<8x72xf32> -> vector<8x72xf32>
    %72 = arith.addf %68, %71 : vector<8x72xf32>
    %73 = vector.extract_strided_slice %0 {offsets = [1, 0, 0], sizes = [1, 8, 4], strides = [1, 1, 1]} : vector<9x8x4xbf16> to vector<1x8x4xbf16>
    %74 = vector.shape_cast %73 : vector<1x8x4xbf16> to vector<8x4xbf16>
    %cst_30 = arith.constant dense<0.000000e+00> : vector<8x72xf32>
    %75 = tpu.matmul %74, %10, %cst_30 {dimension_numbers = #tpu.dot_dimension_numbers<[1], [0], [0], [1], [0, 0, 1, 1], [], []>} : vector<8x4xbf16>, vector<4x72xbf16>, vector<8x72xf32> -> vector<8x72xf32>
    %76 = arith.addf %72, %75 : vector<8x72xf32>
    %77 = vector.extract_strided_slice %0 {offsets = [2, 0, 0], sizes = [1, 8, 4], strides = [1, 1, 1]} : vector<9x8x4xbf16> to vector<1x8x4xbf16>
    %78 = vector.shape_cast %77 : vector<1x8x4xbf16> to vector<8x4xbf16>
    %cst_31 = arith.constant dense<0.000000e+00> : vector<8x72xf32>
    %79 = tpu.matmul %78, %16, %cst_31 {dimension_numbers = #tpu.dot_dimension_numbers<[1], [0], [0], [1], [0, 0, 1, 1], [], []>} : vector<8x4xbf16>, vector<4x72xbf16>, vector<8x72xf32> -> vector<8x72xf32>
    %80 = arith.addf %76, %79 : vector<8x72xf32>
    %81 = vector.extract_strided_slice %0 {offsets = [3, 0, 0], sizes = [1, 8, 4], strides = [1, 1, 1]} : vector<9x8x4xbf16> to vector<1x8x4xbf16>
    %82 = vector.shape_cast %81 : vector<1x8x4xbf16> to vector<8x4xbf16>
    %cst_32 = arith.constant dense<0.000000e+00> : vector<8x72xf32>
    %83 = tpu.matmul %82, %27, %cst_32 {dimension_numbers = #tpu.dot_dimension_numbers<[1], [0], [0], [1], [0, 0, 1, 1], [], []>} : vector<8x4xbf16>, vector<4x72xbf16>, vector<8x72xf32> -> vector<8x72xf32>
    %84 = arith.addf %80, %83 : vector<8x72xf32>
    %85 = vector.extract_strided_slice %0 {offsets = [4, 0, 0], sizes = [1, 8, 4], strides = [1, 1, 1]} : vector<9x8x4xbf16> to vector<1x8x4xbf16>
    %86 = vector.shape_cast %85 : vector<1x8x4xbf16> to vector<8x4xbf16>
    %cst_33 = arith.constant dense<0.000000e+00> : vector<8x72xf32>
    %87 = tpu.matmul %86, %22, %cst_33 {dimension_numbers = #tpu.dot_dimension_numbers<[1], [0], [0], [1], [0, 0, 1, 1], [], []>} : vector<8x4xbf16>, vector<4x72xbf16>, vector<8x72xf32> -> vector<8x72xf32>
    %88 = arith.addf %84, %87 : vector<8x72xf32>
    %89 = vector.extract_strided_slice %0 {offsets = [5, 0, 0], sizes = [1, 8, 4], strides = [1, 1, 1]} : vector<9x8x4xbf16> to vector<1x8x4xbf16>
    %90 = vector.shape_cast %89 : vector<1x8x4xbf16> to vector<8x4xbf16>
    %cst_34 = arith.constant dense<0.000000e+00> : vector<8x72xf32>
    %91 = tpu.matmul %90, %28, %cst_34 {dimension_numbers = #tpu.dot_dimension_numbers<[1], [0], [0], [1], [0, 0, 1, 1], [], []>} : vector<8x4xbf16>, vector<4x72xbf16>, vector<8x72xf32> -> vector<8x72xf32>
    %92 = arith.addf %88, %91 : vector<8x72xf32>
    %93 = vector.extract_strided_slice %0 {offsets = [6, 0, 0], sizes = [1, 8, 4], strides = [1, 1, 1]} : vector<9x8x4xbf16> to vector<1x8x4xbf16>
    %94 = vector.shape_cast %93 : vector<1x8x4xbf16> to vector<8x4xbf16>
    %cst_35 = arith.constant dense<0.000000e+00> : vector<8x72xf32>
    %95 = tpu.matmul %94, %17, %cst_35 {dimension_numbers = #tpu.dot_dimension_numbers<[1], [0], [0], [1], [0, 0, 1, 1], [], []>} : vector<8x4xbf16>, vector<4x72xbf16>, vector<8x72xf32> -> vector<8x72xf32>
    %96 = arith.addf %92, %95 : vector<8x72xf32>
    %97 = vector.extract_strided_slice %0 {offsets = [7, 0, 0], sizes = [1, 8, 4], strides = [1, 1, 1]} : vector<9x8x4xbf16> to vector<1x8x4xbf16>
    %98 = vector.shape_cast %97 : vector<1x8x4xbf16> to vector<8x4xbf16>
    %cst_36 = arith.constant dense<0.000000e+00> : vector<8x72xf32>
    %99 = tpu.matmul %98, %12, %cst_36 {dimension_numbers = #tpu.dot_dimension_numbers<[1], [0], [0], [1], [0, 0, 1, 1], [], []>} : vector<8x4xbf16>, vector<4x72xbf16>, vector<8x72xf32> -> vector<8x72xf32>
    %100 = arith.addf %96, %99 : vector<8x72xf32>
    %101 = vector.extract_strided_slice %0 {offsets = [8, 0, 0], sizes = [1, 8, 4], strides = [1, 1, 1]} : vector<9x8x4xbf16> to vector<1x8x4xbf16>
    %102 = vector.shape_cast %101 : vector<1x8x4xbf16> to vector<8x4xbf16>
    %cst_37 = arith.constant dense<0.000000e+00> : vector<8x72xf32>
    %103 = tpu.matmul %102, %18, %cst_37 {dimension_numbers = #tpu.dot_dimension_numbers<[1], [0], [0], [1], [0, 0, 1, 1], [], []>} : vector<8x4xbf16>, vector<4x72xbf16>, vector<8x72xf32> -> vector<8x72xf32>
    %104 = arith.addf %100, %103 : vector<8x72xf32>
    %cst_38 = arith.constant 0.000000e+00 : f32
    %105 = vector.broadcast %cst_38 : f32 to vector<8x72xf32>
    %106 = vector.extract_strided_slice %0 {offsets = [0, 0, 0], sizes = [1, 8, 4], strides = [1, 1, 1]} : vector<9x8x4xbf16> to vector<1x8x4xbf16>
    %107 = vector.shape_cast %106 : vector<1x8x4xbf16> to vector<8x4xbf16>
    %cst_39 = arith.constant dense<0.000000e+00> : vector<8x72xf32>
    %108 = tpu.matmul %107, %21, %cst_39 {dimension_numbers = #tpu.dot_dimension_numbers<[1], [0], [0], [1], [0, 0, 1, 1], [], []>} : vector<8x4xbf16>, vector<4x72xbf16>, vector<8x72xf32> -> vector<8x72xf32>
    %109 = arith.addf %105, %108 : vector<8x72xf32>
    %110 = vector.extract_strided_slice %0 {offsets = [1, 0, 0], sizes = [1, 8, 4], strides = [1, 1, 1]} : vector<9x8x4xbf16> to vector<1x8x4xbf16>
    %111 = vector.shape_cast %110 : vector<1x8x4xbf16> to vector<8x4xbf16>
    %cst_40 = arith.constant dense<0.000000e+00> : vector<8x72xf32>
    %112 = tpu.matmul %111, %27, %cst_40 {dimension_numbers = #tpu.dot_dimension_numbers<[1], [0], [0], [1], [0, 0, 1, 1], [], []>} : vector<8x4xbf16>, vector<4x72xbf16>, vector<8x72xf32> -> vector<8x72xf32>
    %113 = arith.addf %109, %112 : vector<8x72xf32>
    %114 = vector.extract_strided_slice %0 {offsets = [2, 0, 0], sizes = [1, 8, 4], strides = [1, 1, 1]} : vector<9x8x4xbf16> to vector<1x8x4xbf16>
    %115 = vector.shape_cast %114 : vector<1x8x4xbf16> to vector<8x4xbf16>
    %cst_41 = arith.constant dense<0.000000e+00> : vector<8x72xf32>
    %116 = tpu.matmul %115, %22, %cst_41 {dimension_numbers = #tpu.dot_dimension_numbers<[1], [0], [0], [1], [0, 0, 1, 1], [], []>} : vector<8x4xbf16>, vector<4x72xbf16>, vector<8x72xf32> -> vector<8x72xf32>
    %117 = arith.addf %113, %116 : vector<8x72xf32>
    %118 = vector.extract_strided_slice %0 {offsets = [3, 0, 0], sizes = [1, 8, 4], strides = [1, 1, 1]} : vector<9x8x4xbf16> to vector<1x8x4xbf16>
    %119 = vector.shape_cast %118 : vector<1x8x4xbf16> to vector<8x4xbf16>
    %cst_42 = arith.constant dense<0.000000e+00> : vector<8x72xf32>
    %120 = tpu.matmul %119, %11, %cst_42 {dimension_numbers = #tpu.dot_dimension_numbers<[1], [0], [0], [1], [0, 0, 1, 1], [], []>} : vector<8x4xbf16>, vector<4x72xbf16>, vector<8x72xf32> -> vector<8x72xf32>
    %121 = arith.addf %117, %120 : vector<8x72xf32>
    %122 = vector.extract_strided_slice %0 {offsets = [4, 0, 0], sizes = [1, 8, 4], strides = [1, 1, 1]} : vector<9x8x4xbf16> to vector<1x8x4xbf16>
    %123 = vector.shape_cast %122 : vector<1x8x4xbf16> to vector<8x4xbf16>
    %cst_43 = arith.constant dense<0.000000e+00> : vector<8x72xf32>
    %124 = tpu.matmul %123, %17, %cst_43 {dimension_numbers = #tpu.dot_dimension_numbers<[1], [0], [0], [1], [0, 0, 1, 1], [], []>} : vector<8x4xbf16>, vector<4x72xbf16>, vector<8x72xf32> -> vector<8x72xf32>
    %125 = arith.addf %121, %124 : vector<8x72xf32>
    %126 = vector.extract_strided_slice %0 {offsets = [5, 0, 0], sizes = [1, 8, 4], strides = [1, 1, 1]} : vector<9x8x4xbf16> to vector<1x8x4xbf16>
    %127 = vector.shape_cast %126 : vector<1x8x4xbf16> to vector<8x4xbf16>
    %cst_44 = arith.constant dense<0.000000e+00> : vector<8x72xf32>
    %128 = tpu.matmul %127, %12, %cst_44 {dimension_numbers = #tpu.dot_dimension_numbers<[1], [0], [0], [1], [0, 0, 1, 1], [], []>} : vector<8x4xbf16>, vector<4x72xbf16>, vector<8x72xf32> -> vector<8x72xf32>
    %129 = arith.addf %125, %128 : vector<8x72xf32>
    %130 = vector.extract_strided_slice %0 {offsets = [6, 0, 0], sizes = [1, 8, 4], strides = [1, 1, 1]} : vector<9x8x4xbf16> to vector<1x8x4xbf16>
    %131 = vector.shape_cast %130 : vector<1x8x4xbf16> to vector<8x4xbf16>
    %cst_45 = arith.constant dense<0.000000e+00> : vector<8x72xf32>
    %132 = tpu.matmul %131, %23, %cst_45 {dimension_numbers = #tpu.dot_dimension_numbers<[1], [0], [0], [1], [0, 0, 1, 1], [], []>} : vector<8x4xbf16>, vector<4x72xbf16>, vector<8x72xf32> -> vector<8x72xf32>
    %133 = arith.addf %129, %132 : vector<8x72xf32>
    %134 = vector.extract_strided_slice %0 {offsets = [7, 0, 0], sizes = [1, 8, 4], strides = [1, 1, 1]} : vector<9x8x4xbf16> to vector<1x8x4xbf16>
    %135 = vector.shape_cast %134 : vector<1x8x4xbf16> to vector<8x4xbf16>
    %cst_46 = arith.constant dense<0.000000e+00> : vector<8x72xf32>
    %136 = tpu.matmul %135, %29, %cst_46 {dimension_numbers = #tpu.dot_dimension_numbers<[1], [0], [0], [1], [0, 0, 1, 1], [], []>} : vector<8x4xbf16>, vector<4x72xbf16>, vector<8x72xf32> -> vector<8x72xf32>
    %137 = arith.addf %133, %136 : vector<8x72xf32>
    %138 = vector.extract_strided_slice %0 {offsets = [8, 0, 0], sizes = [1, 8, 4], strides = [1, 1, 1]} : vector<9x8x4xbf16> to vector<1x8x4xbf16>
    %139 = vector.shape_cast %138 : vector<1x8x4xbf16> to vector<8x4xbf16>
    %cst_47 = arith.constant dense<0.000000e+00> : vector<8x72xf32>
    %140 = tpu.matmul %139, %24, %cst_47 {dimension_numbers = #tpu.dot_dimension_numbers<[1], [0], [0], [1], [0, 0, 1, 1], [], []>} : vector<8x4xbf16>, vector<4x72xbf16>, vector<8x72xf32> -> vector<8x72xf32>
    %141 = arith.addf %137, %140 : vector<8x72xf32>
    %cst_48 = arith.constant 0.000000e+00 : f32
    %142 = vector.broadcast %cst_48 : f32 to vector<8x72xf32>
    %143 = vector.extract_strided_slice %0 {offsets = [0, 0, 0], sizes = [1, 8, 4], strides = [1, 1, 1]} : vector<9x8x4xbf16> to vector<1x8x4xbf16>
    %144 = vector.shape_cast %143 : vector<1x8x4xbf16> to vector<8x4xbf16>
    %cst_49 = arith.constant dense<0.000000e+00> : vector<8x72xf32>
    %145 = tpu.matmul %144, %27, %cst_49 {dimension_numbers = #tpu.dot_dimension_numbers<[1], [0], [0], [1], [0, 0, 1, 1], [], []>} : vector<8x4xbf16>, vector<4x72xbf16>, vector<8x72xf32> -> vector<8x72xf32>
    %146 = arith.addf %142, %145 : vector<8x72xf32>
    %147 = vector.extract_strided_slice %0 {offsets = [1, 0, 0], sizes = [1, 8, 4], strides = [1, 1, 1]} : vector<9x8x4xbf16> to vector<1x8x4xbf16>
    %148 = vector.shape_cast %147 : vector<1x8x4xbf16> to vector<8x4xbf16>
    %cst_50 = arith.constant dense<0.000000e+00> : vector<8x72xf32>
    %149 = tpu.matmul %148, %22, %cst_50 {dimension_numbers = #tpu.dot_dimension_numbers<[1], [0], [0], [1], [0, 0, 1, 1], [], []>} : vector<8x4xbf16>, vector<4x72xbf16>, vector<8x72xf32> -> vector<8x72xf32>
    %150 = arith.addf %146, %149 : vector<8x72xf32>
    %151 = vector.extract_strided_slice %0 {offsets = [2, 0, 0], sizes = [1, 8, 4], strides = [1, 1, 1]} : vector<9x8x4xbf16> to vector<1x8x4xbf16>
    %152 = vector.shape_cast %151 : vector<1x8x4xbf16> to vector<8x4xbf16>
    %cst_51 = arith.constant dense<0.000000e+00> : vector<8x72xf32>
    %153 = tpu.matmul %152, %28, %cst_51 {dimension_numbers = #tpu.dot_dimension_numbers<[1], [0], [0], [1], [0, 0, 1, 1], [], []>} : vector<8x4xbf16>, vector<4x72xbf16>, vector<8x72xf32> -> vector<8x72xf32>
    %154 = arith.addf %150, %153 : vector<8x72xf32>
    %155 = vector.extract_strided_slice %0 {offsets = [3, 0, 0], sizes = [1, 8, 4], strides = [1, 1, 1]} : vector<9x8x4xbf16> to vector<1x8x4xbf16>
    %156 = vector.shape_cast %155 : vector<1x8x4xbf16> to vector<8x4xbf16>
    %cst_52 = arith.constant dense<0.000000e+00> : vector<8x72xf32>
    %157 = tpu.matmul %156, %17, %cst_52 {dimension_numbers = #tpu.dot_dimension_numbers<[1], [0], [0], [1], [0, 0, 1, 1], [], []>} : vector<8x4xbf16>, vector<4x72xbf16>, vector<8x72xf32> -> vector<8x72xf32>
    %158 = arith.addf %154, %157 : vector<8x72xf32>
    %159 = vector.extract_strided_slice %0 {offsets = [4, 0, 0], sizes = [1, 8, 4], strides = [1, 1, 1]} : vector<9x8x4xbf16> to vector<1x8x4xbf16>
    %160 = vector.shape_cast %159 : vector<1x8x4xbf16> to vector<8x4xbf16>
    %cst_53 = arith.constant dense<0.000000e+00> : vector<8x72xf32>
    %161 = tpu.matmul %160, %12, %cst_53 {dimension_numbers = #tpu.dot_dimension_numbers<[1], [0], [0], [1], [0, 0, 1, 1], [], []>} : vector<8x4xbf16>, vector<4x72xbf16>, vector<8x72xf32> -> vector<8x72xf32>
    %162 = arith.addf %158, %161 : vector<8x72xf32>
    %163 = vector.extract_strided_slice %0 {offsets = [5, 0, 0], sizes = [1, 8, 4], strides = [1, 1, 1]} : vector<9x8x4xbf16> to vector<1x8x4xbf16>
    %164 = vector.shape_cast %163 : vector<1x8x4xbf16> to vector<8x4xbf16>
    %cst_54 = arith.constant dense<0.000000e+00> : vector<8x72xf32>
    %165 = tpu.matmul %164, %18, %cst_54 {dimension_numbers = #tpu.dot_dimension_numbers<[1], [0], [0], [1], [0, 0, 1, 1], [], []>} : vector<8x4xbf16>, vector<4x72xbf16>, vector<8x72xf32> -> vector<8x72xf32>
    %166 = arith.addf %162, %165 : vector<8x72xf32>
    %167 = vector.extract_strided_slice %0 {offsets = [6, 0, 0], sizes = [1, 8, 4], strides = [1, 1, 1]} : vector<9x8x4xbf16> to vector<1x8x4xbf16>
    %168 = vector.shape_cast %167 : vector<1x8x4xbf16> to vector<8x4xbf16>
    %cst_55 = arith.constant dense<0.000000e+00> : vector<8x72xf32>
    %169 = tpu.matmul %168, %29, %cst_55 {dimension_numbers = #tpu.dot_dimension_numbers<[1], [0], [0], [1], [0, 0, 1, 1], [], []>} : vector<8x4xbf16>, vector<4x72xbf16>, vector<8x72xf32> -> vector<8x72xf32>
    %170 = arith.addf %166, %169 : vector<8x72xf32>
    %171 = vector.extract_strided_slice %0 {offsets = [7, 0, 0], sizes = [1, 8, 4], strides = [1, 1, 1]} : vector<9x8x4xbf16> to vector<1x8x4xbf16>
    %172 = vector.shape_cast %171 : vector<1x8x4xbf16> to vector<8x4xbf16>
    %cst_56 = arith.constant dense<0.000000e+00> : vector<8x72xf32>
    %173 = tpu.matmul %172, %24, %cst_56 {dimension_numbers = #tpu.dot_dimension_numbers<[1], [0], [0], [1], [0, 0, 1, 1], [], []>} : vector<8x4xbf16>, vector<4x72xbf16>, vector<8x72xf32> -> vector<8x72xf32>
    %174 = arith.addf %170, %173 : vector<8x72xf32>
    %175 = vector.extract_strided_slice %0 {offsets = [8, 0, 0], sizes = [1, 8, 4], strides = [1, 1, 1]} : vector<9x8x4xbf16> to vector<1x8x4xbf16>
    %176 = vector.shape_cast %175 : vector<1x8x4xbf16> to vector<8x4xbf16>
    %cst_57 = arith.constant dense<0.000000e+00> : vector<8x72xf32>
    %177 = tpu.matmul %176, %30, %cst_57 {dimension_numbers = #tpu.dot_dimension_numbers<[1], [0], [0], [1], [0, 0, 1, 1], [], []>} : vector<8x4xbf16>, vector<4x72xbf16>, vector<8x72xf32> -> vector<8x72xf32>
    %178 = arith.addf %174, %177 : vector<8x72xf32>
    %179 = arith.mulf %67, %3 : vector<8x72xf32>
    %180 = arith.addf %179, %6 : vector<8x72xf32>
    %181 = arith.mulf %104, %3 : vector<8x72xf32>
    %182 = arith.addf %181, %6 : vector<8x72xf32>
    %183 = arith.maximumf %180, %182 : vector<8x72xf32>
    %184 = arith.mulf %141, %3 : vector<8x72xf32>
    %185 = arith.addf %184, %6 : vector<8x72xf32>
    %186 = arith.maximumf %183, %185 : vector<8x72xf32>
    %187 = arith.mulf %178, %3 : vector<8x72xf32>
    %188 = arith.addf %187, %6 : vector<8x72xf32>
    %189 = arith.maximumf %186, %188 : vector<8x72xf32>
    %cst_58 = arith.constant 0.000000e+00 : f32
    %190 = vector.broadcast %cst_58 : f32 to vector<8x72xf32>
    %191 = arith.maximumf %189, %190 : vector<8x72xf32>
    %c0_59 = arith.constant 0 : index
    %c0_60 = arith.constant 0 : index
    %c0_61 = arith.constant 0 : index
    %192 = vector.load %arg5[%c0_59, %c0_60, %c0_61] : memref<1x8x72xf32, #tpu.memory_space<vmem>>, vector<1x8x72xf32>
    %193 = vector.shape_cast %192 : vector<1x8x72xf32> to vector<8x72xf32>
    %194 = vector.shape_cast %191 : vector<8x72xf32> to vector<1x8x72xf32>
    tpu.vector_store %arg5[%c0_59, %c0_60, %c0_61], %194 {strides = array<i32>} : memref<1x8x72xf32, #tpu.memory_space<vmem>>, vector<1x8x72xf32>,
    return
  }
  func.func @transform_0(%arg0: i32) -> (i32, i32, i32, i32) {
    %c0_i32 = arith.constant 0 : i32
    %c0_i32_0 = arith.constant 0 : i32
    %c0_i32_1 = arith.constant 0 : i32
    %c0_i32_2 = arith.constant 0 : i32
    return %c0_i32, %arg0, %c0_i32_0, %c0_i32_1 : i32, i32, i32, i32
  }
  func.func @transform_1(%arg0: i32) -> (i32, i32, i32) {
    %c0_i32 = arith.constant 0 : i32
    %c0_i32_0 = arith.constant 0 : i32
    %c0_i32_1 = arith.constant 0 : i32
    %c0_i32_2 = arith.constant 0 : i32
    return %c0_i32, %c0_i32_0, %c0_i32_1 : i32, i32, i32
  }
  func.func @transform_2(%arg0: i32) -> (i32, i32) {
    %c0_i32 = arith.constant 0 : i32
    %c0_i32_0 = arith.constant 0 : i32
    %c0_i32_1 = arith.constant 0 : i32
    return %c0_i32, %c0_i32_0 : i32, i32
  }
  func.func @transform_3(%arg0: i32) -> (i32, i32) {
    %c0_i32 = arith.constant 0 : i32
    %c0_i32_0 = arith.constant 0 : i32
    %c0_i32_1 = arith.constant 0 : i32
    return %c0_i32, %c0_i32_0 : i32, i32
  }
  func.func @transform_4(%arg0: i32) -> (i32, i32, i32) {
    %c0_i32 = arith.constant 0 : i32
    %c0_i32_0 = arith.constant 0 : i32
    %c0_i32_1 = arith.constant 0 : i32
    return %arg0, %c0_i32, %c0_i32_0 : i32, i32, i32
  }
}

</mosaic_0001>

<bundles_post_ra>
// kernel: convblock_forward.3
= control target key start
LH: loop header
LB: loop body
LE: loop exit
PB: predicated region body
PF: predicated region fallthrough
CT: control target
= control target key end

     0   :  { %s2507_s15 = smov 0   ;;  %s2509_s16 = smov 0   ;;  %s2836_s0 = inlined_call_operand.vmem [shape: bf16[4,2,4,89], index: 0, kind: input, shape index: {}]   ;;  %s2837_s1 = inlined_call_operand.vmem [shape: bf16[9,8,4], index: 1, kind: input, shape index: {}]   ;;  %s2838_s2 = inlined_call_operand.vmem [shape: f32[8,1], index: 2, kind: input, shape index: {}]   ;;  %s2839_s3 = inlined_call_operand.vmem [shape: f32[8,1], index: 3, kind: input, shape index: {}]   ;;  %s2840_s4 = inlined_call_operand.vmem [shape: f32[2,8,72], index: 4, kind: output, shape index: {}]  }
   0x1   :  { %s2511_s17 = smov 0  }
   0x2 LB: > { %s1952_s18 = sadd.s32 4294967295, %s2473_s17   ;;  %s2524_s19 = sadd.s32 1, %s2473_s17   ;;  %s2473_s17 = sphi %s2511_s17, %s2843_s17   ;;  %s2469_s16 = sphi %s2509_s16, %s2842_s16   ;;  %s2465_s15 = sphi %s2507_s15, %s2841_s15  }
   0x3   : > { %s18_s20 = ssub.s32 %s2473_s17, %s2524_s19  ;;  %s21_s21 = sadd.s32 1, %s2469_s16 }
   0x4   : > { %p19_p0 = scmp.eq.s32.totalorder %s18_s20, 0  ;;  %p28_p1 = scmp.ne.s32.totalorder %s2469_s16, %s2465_s15 }
   0x5   : > { %p29_p2 = scmp.eq.s32.totalorder %s2473_s17, 0  ;;  %p1955_p4 = scmp.ge.s32.totalorder %s2473_s17, 2 }
   0x6   : > { %s2533_s22 = scalar_select %p19_p0, %s2469_s16, %s21_s21  }
   0x7   : > { %p30_p3 = por %p29_p2, %p28_p1  ;;  %152 = sbr.rel (%p1955_p4) target bundleno = 21 (0x15), region = 28 }
   0xe   : > { %155 = sbr.rel (!%p30_p3) target bundleno = 21 (0x15), region = 32  ;;  %s157_s23 = sand.u32 (%p30_p3), 1, %s2469_s16  }
   0xf   : > { %s1957_s24 = sshll.u32 (%p30_p3), %s2473_s17, 1  ;;  %s1956_s25 = sshll.u32 (%p30_p3), %s157_s23, 3 }
  0x10   : > { %s161_s28 = scalar_lea.vmem (%p30_p3), %s2836_s0, %s1957_s24  ;;  %s159_s29 = scalar_lea.vmem (%p30_p3), [#allocation2], %s1956_s25 }
  0x11   : > { %v177_v0 = vld [vmem:[%s161_s28] sm:$0x3] (%p30_p3)  ;;  %v179_v1 = vld [vmem:[%s161_s28 + $0x4] sm:$0x3] (%p30_p3)  ;;  %v181_v2 = vld [vmem:[%s161_s28 + $0x8] sm:$0x3] (%p30_p3) }
  0x12   : > { %178 = vst [vmem:[%s159_s29] sm:$0x3] (%p30_p3), %v177_v0  ;;  %180 = vst [vmem:[%s159_s29 + $0x2] sm:$0x3] (%p30_p3), %v179_v1  ;;  %v183_v3 = vld [vmem:[%s161_s28 + $0xc] sm:$0x3] (%p30_p3) }
  0x13   : > { %182 = vst [vmem:[%s159_s29 + $0x4] sm:$0x3] (%p30_p3), %v181_v2  ;;  %184 = vst [vmem:[%s159_s29 + $0x6] sm:$0x3] (%p30_p3), %v183_v3 }
  0x15 PF: > { %p1958_p5 = scmp.ge.s32.totalorder %s2473_s17, 1  ;;  %p214_p6 = scmp.lt.s32.totalorder %s2473_s17, 3 }
  0x17   : > { %p215_p7 = pnand %p1958_p5, %p214_p6 }
  0x18   : > { %s221_s30 = sand.u32 (!%p215_p7), 1, %s2465_s15   ;;  %v376_v4 = vlaneseq (!%p215_p7)  ;;  %v2475_v5 = vmov (!%p215_p7), 1983009808   ;;  %v2476_v7 = vmov (!%p215_p7), 0.0   ;;  %vm282_vm0 = vcmask (!%p215_p7), 1041408   ;;  %s2478_s9 = smov (!%p215_p7), 127  }
  0x19   : > { %218 = sbr.rel (%p215_p7) target bundleno = 573 (0x23d), region = 73  ;;  %s1959_s5 = sshll.u32 (!%p215_p7), %s221_s30, 3  ;;  %v374_v6 = vunpack.c.l.s4 (!%p215_p7), %v2475_v5  ;;  %2074 = vmatprep.subr.bf16.mxu0 (!%p215_p7), %v2476_v7  ;;  %2128 = vmatprep.subr.bf16.mxu1 (!%p215_p7), %v2476_v7  ;;  %vm2477_vm1 = vmmov (!%p215_p7), 0   ;;  %v2554_v15 = vld [vmem:[%s2837_s1 + $0x4] sm:$0xf] (!%p215_p7)  ;;  %vm278_vm2 = vcmask (!%p215_p7), 31744  }
  0x1a   : > { %v377_v8 = vshrl.u32 (!%p215_p7), %v376_v4, 7  ;;  %2076 = vmatprep.mubr.msk.bf16.mxu0 (!%p215_p7), %vm2477_vm1, %v2476_v7  ;;  %2130 = vmatprep.mubr.msk.bf16.mxu1 (!%p215_p7), %vm2477_vm1, %v2476_v7  ;;  %s223_s6 = scalar_lea.vmem (!%p215_p7), [#allocation2], %s1959_s5  ;;  %s2479_s10 = smov (!%p215_p7), 119   ;;  %v2566_v22 = vld [vmem:[%s2837_s1] sm:$0xf] (!%p215_p7)  ;;  %v2481_v36 = vmov (!%p215_p7), 0  }
  0x1b   : > { %v375_v9 = vunpack.c.0.s8 (!%p215_p7), %v374_v6  ;;  %v1961_v10 = vld [vmem:[%s223_s6 + $0x2] sm:$0x3] (!%p215_p7)  ;;  %v271_v11 = vld [vmem:[%s223_s6] sm:$0x3] (!%p215_p7)  ;;  %v1962_v12 = vld [vmem:[%s223_s6 + $0x4] sm:$0x3] (!%p215_p7)  ;;  %2449 = vset.pattern.permute.xlu0 (!%p215_p7), %v2481_v36  ;;  %2450 = vset.pattern.permute.xlu1 (!%p215_p7), %v2481_v36 }
  0x1c   : > { %v284_v13 = vsel (!%p215_p7), %vm282_vm0, %v1961_v10, 0  ;;  %v1963_v16 = vld [vmem:[%s223_s6 + $0x6] sm:$0x3] (!%p215_p7)  ;;  %v330_v19 = vsel (!%p215_p7), %vm282_vm0, %v271_v11, 0  ;;  %s2480_s13 = smov (!%p215_p7), 118   ;;  %v2581_v26 = vsel (!%p215_p7), %vm282_vm0, %v1962_v12, 0 }
  0x1d   : > { %v378_v14 = vsub.s32 (!%p215_p7), %v375_v9, %v377_v8  ;;  %2075 = vmatpush3.bf16.msra.mxu0 (!%p215_p7), %v284_v13  ;;  %v2576_v25 = vld [vmem:[%s2837_s1 + $0x8] sm:$0xf] (!%p215_p7)  ;;  %v2597_v28 = vld [vmem:[%s2837_s1 + $0xc] sm:$0xf] (!%p215_p7)  ;;  %v2601_v30 = vsel (!%p215_p7), %vm282_vm0, %v1963_v16, 0  ;;  %v259_v34 = vld [vmem:[%s2838_s2] sm:$0xff] (!%p215_p7) }
  0x1e   : > { %2080 = vmatprep.subr.bf16.mxu0 (!%p215_p7), %v2476_v7  ;;  %v2617_v32 = vld [vmem:[%s2837_s1 + $0x10] sm:$0xf] (!%p215_p7)  ;;  %v265_v35 = vld [vmem:[%s2839_s3] sm:$0xff] (!%p215_p7)  ;;  %v2643_v38 = vld [vmem:[%s2837_s1 + $0x14] sm:$0xf] (!%p215_p7)  ;;  %p245_p8 = scmp.lt.s32.totalorder (!%p215_p7), %s1952_s18, 1 }
  0x1f   : > { %v379_v17 = vrot.slane (!%p215_p7), %v271_v11, %v378_v14  ;;  %v530_v18 = vrot.slane (!%p215_p7), %v1962_v12, %v378_v14  ;;  %v636_v20 = vrot.slane (!%p215_p7), %v1961_v10, %v378_v14  ;;  %v950_v21 = vrot.slane (!%p215_p7), %v1963_v16, %v378_v14  ;;  %v2660_v42 = vld [vmem:[%s2837_s1 + $0x18] sm:$0xf] (!%p215_p7)  ;;  %v2680_v46 = vld [vmem:[%s2837_s1 + $0x1c] sm:$0xf] (!%p215_p7)  ;;  %v2700_v48 = vld [vmem:[%s2837_s1 + $0x20] sm:$0xf] (!%p215_p7) }
  0x20   : > { %2077 = vmatmul.mubr.msk.bf16.vlgmr.msra.gmra.mrb[0].mxu0 %vm278_vm2, %v2554_v15  ;;  %s2845_s18 = smov (!%p245_p8, %s1952_s18), 1  ;;  %vm1891_vm3 = vcmask 588800  }
  0x21   : > { %380 = vrot.lane.b32.xlu0 %v379_v17, %s2478_s9  ;;  %531 = vrot.lane.b32.xlu1 %v530_v18, %s2478_s9  ;;  %s1960_s11 = sshll.u32 %s2845_s18, 3 }
  0x22   : > { %2081 = vmatpush3.bf16.msra.mxu0 %v330_v19  ;;  %2082 = vmatprep.mubr.msk.bf16.mxu0 %vm2477_vm1, %v2476_v7  ;;  %s248_s14 = scalar_lea.vmem %s2840_s4, %s1960_s11 }
  0x23   : > { %2086 = vmatprep.subr.bf16.mxu0 %v2476_v7 }
  0x25   : > { %815 = vrot.lane.b32.xlu0 %v636_v20, %s2478_s9  ;;  %951 = vrot.lane.b32.xlu1 %v950_v21, %s2478_s9 }
  0x29   : > { %580 = vrot.lane.b32.xlu0 %v379_v17, %s2479_s10  ;;  %637 = vrot.lane.b32.xlu1 %v636_v20, %s2479_s10 }
  0x2c   : > { %2083 = vmatmul.mubr.msk.bf16.vlgmr.msra.gmra.mrb[0].mxu0 %vm278_vm2, %v2566_v22 }
  0x2d   : > { %686 = vrot.lane.b32.xlu0 %v379_v17, %s2480_s13  ;;  %1079 = vrot.lane.b32.xlu1 %v636_v20, %s2480_s13 }
  0x2e   : > { %2088 = vmatprep.mubr.msk.bf16.mxu0 %vm2477_vm1, %v2476_v7 }
  0x31   : > { %1369 = vrot.lane.b32.xlu0 %v530_v18, %s2479_s10  ;;  %1415 = vrot.lane.b32.xlu1 %v950_v21, %s2479_s10 }
  0x35   : > { %1461 = vrot.lane.b32.xlu0 %v530_v18, %s2480_s13  ;;  %1833 = vrot.lane.b32.xlu1 %v950_v21, %s2480_s13 }
  0x39   : > { %262 = vperm.xlu0 %2449, %v259_v34   ;;  %268 = vperm.xlu1 %2450, %v265_v35  }
  0x93   : > { %v381_v23 = vpop.permute.xlu0 %380  ;;  %v532_v31 = vpop.permute.xlu1 %531 }
  0x94   : > { %v386_v24 = vsel %vm282_vm0, %v381_v23, 0  ;;  %v2620_v33 = vsel %vm282_vm0, %v532_v31, 0 }
  0x95   : > { %2087 = vmatpush3.bf16.msra.mxu0 %v386_v24  ;;  %2129 = vmatpush3.bf16.msra.mxu1 %v386_v24 }
  0x96   : > { %2134 = vmatprep.subr.bf16.mxu1 %v2476_v7  ;;  %2092 = vmatprep.subr.bf16.mxu0 %v2476_v7 }
  0x97   : > { %v816_v27 = vpop.permute.xlu0 %815  ;;  %v952_v40 = vpop.permute.xlu1 %951 }
  0x98   : > { %2089 = vmatmul.mubr.msk.bf16.vlgmr.msra.gmra.mrb[0].mxu0 %vm278_vm2, %v2576_v25  ;;  %2131 = vmatmul.mubr.msk.bf16.vlgmr.msra.gmra.mrb[0].mxu1 %vm278_vm2, %v2554_v15  ;;  %v818_v29 = vsel %vm282_vm0, %v816_v27, 0  ;;  %v954_v43 = vsel %vm282_vm0, %v952_v40, 0 }
  0x99   : > { %2135 = vmatpush3.bf16.msra.mxu1 %v284_v13  ;;  %2093 = vmatpush3.bf16.msra.mxu0 %v2581_v26 }
  0x9a   : > { %2136 = vmatprep.mubr.msk.bf16.mxu1 %vm2477_vm1, %v2476_v7  ;;  %2094 = vmatprep.mubr.msk.bf16.mxu0 %vm2477_vm1, %v2476_v7 }
  0x9b   : > { %2140 = vmatprep.subr.bf16.mxu1 %v2476_v7  ;;  %2098 = vmatprep.subr.bf16.mxu0 %v2476_v7  ;;  %v581_v37 = vpop.permute.xlu0 %580  ;;  %v638_v41 = vpop.permute.xlu1 %637 }
  0x9c   : > { %v586_v39 = vsel %vm282_vm0, %v581_v37, 0  ;;  %v2664_v44 = vsel %vm282_vm0, %v638_v41, 0 }
  0x9f   : > { %v687_v45 = vpop.permute.xlu0 %686  ;;  %v1080_v49 = vpop.permute.xlu1 %1079 }
  0xa0   : > { %v2683_v47 = vsel %vm282_vm0, %v687_v45, 0  ;;  %v1082_v50 = vsel %vm282_vm0, %v1080_v49, 0 }
  0xa3   : > { %v1370_v51 = vpop.permute.xlu0 %1369  ;;  %v1416_v53 = vpop.permute.xlu1 %1415 }
  0xa4   : > { %2095 = vmatmul.mubr.msk.bf16.vlgmr.msra.gmra.mrb[0].mxu0 %vm278_vm2, %v2597_v28  ;;  %2137 = vmatmul.mubr.msk.bf16.vlgmr.msra.gmra.mrb[0].mxu1 %vm278_vm2, %v2566_v22  ;;  %v1372_v52 = vsel %vm282_vm0, %v1370_v51, 0  ;;  %v1418_v54 = vsel %vm282_vm0, %v1416_v53, 0 }
  0xa5   : > { %2141 = vmatpush3.bf16.msra.mxu1 %v818_v29  ;;  %2099 = vmatpush3.bf16.msra.mxu0 %v2601_v30 }
  0xa6   : > { %2100 = vmatprep.mubr.msk.bf16.mxu0 %vm2477_vm1, %v2476_v7  ;;  %2142 = vmatprep.mubr.msk.bf16.mxu1 %vm2477_vm1, %v2476_v7 }
  0xa7   : > { %2146 = vmatprep.subr.bf16.mxu1 %v2476_v7  ;;  %2104 = vmatprep.subr.bf16.mxu0 %v2476_v7  ;;  %v1462_v55 = vpop.permute.xlu0 %1461  ;;  %v1834_v57 = vpop.permute.xlu1 %1833 }
  0xa8   : > { %v1464_v56 = vsel %vm282_vm0, %v1462_v55, 0  ;;  %v1836_v58 = vsel %vm282_vm0, %v1834_v57, 0 }
  0xb0   : > { %2101 = vmatmul.mubr.msk.bf16.vlgmr.msra.gmra.mrb[0].mxu0 %vm278_vm2, %v2617_v32  ;;  %2143 = vmatmul.mubr.msk.bf16.vlgmr.msra.gmra.mrb[0].mxu1 %vm278_vm2, %v2576_v25 }
  0xb1   : > { %2147 = vmatpush3.bf16.msra.mxu1 %v2601_v30  ;;  %2105 = vmatpush3.bf16.msra.mxu0 %v2620_v33 }
  0xb2   : > { %2106 = vmatprep.mubr.msk.bf16.mxu0 %vm2477_vm1, %v2476_v7  ;;  %2148 = vmatprep.mubr.msk.bf16.mxu1 %vm2477_vm1, %v2476_v7 }
  0xb3   : > { %2152 = vmatprep.subr.bf16.mxu1 %v2476_v7  ;;  %2110 = vmatprep.subr.bf16.mxu0 %v2476_v7 }
  0xb8   : > { %v263_v63 = vpop.permute.xlu0 %262  ;;  %v269_v1 = vpop.permute.xlu1 %268 }
  0xbc   : > { %2107 = vmatmul.mubr.msk.bf16.vlgmr.msra.gmra.mrb[0].mxu0 %vm278_vm2, %v2643_v38  ;;  %2149 = vmatmul.mubr.msk.bf16.vlgmr.msra.gmra.mrb[0].mxu1 %vm278_vm2, %v2597_v28 }
  0xbd   : > { %2153 = vmatpush3.bf16.msra.mxu1 %v2620_v33  ;;  %2111 = vmatpush3.bf16.msra.mxu0 %v586_v39 }
  0xbe   : > { %2112 = vmatprep.mubr.msk.bf16.mxu0 %vm2477_vm1, %v2476_v7  ;;  %2154 = vmatprep.mubr.msk.bf16.mxu1 %vm2477_vm1, %v2476_v7 }
  0xbf   : > { %2158 = vmatprep.subr.bf16.mxu1 %v2476_v7  ;;  %2116 = vmatprep.subr.bf16.mxu0 %v2476_v7 }
  0xc8   : > { %2113 = vmatmul.mubr.msk.bf16.vlgmr.msra.gmra.mrb[0].mxu0 %vm278_vm2, %v2660_v42  ;;  %2155 = vmatmul.mubr.msk.bf16.vlgmr.msra.gmra.mrb[0].mxu1 %vm278_vm2, %v2617_v32 }
  0xc9   : > { %2159 = vmatpush3.bf16.msra.mxu1 %v954_v43  ;;  %2117 = vmatpush3.bf16.msra.mxu0 %v2664_v44 }
  0xca   : > { %2118 = vmatprep.mubr.msk.bf16.mxu0 %vm2477_vm1, %v2476_v7  ;;  %2160 = vmatprep.mubr.msk.bf16.mxu1 %vm2477_vm1, %v2476_v7 }
  0xcb   : > { %2164 = vmatprep.subr.bf16.mxu1 %v2476_v7  ;;  %2122 = vmatprep.subr.bf16.mxu0 %v2476_v7 }
  0xd4   : > { %2119 = vmatmul.mubr.msk.bf16.vlgmr.msra.gmra.mrb[0].mxu0 %vm278_vm2, %v2680_v46  ;;  %2161 = vmatmul.mubr.msk.bf16.vlgmr.msra.gmra.mrb[0].mxu1 %vm278_vm2, %v2643_v38 }
  0xd5   : > { %2165 = vmatpush3.bf16.msra.mxu1 %v2664_v44  ;;  %2123 = vmatpush3.bf16.msra.mxu0 %v2683_v47 }
  0xd6   : > { %2124 = vmatprep.mubr.msk.bf16.mxu0 %vm2477_vm1, %v2476_v7  ;;  %2166 = vmatprep.mubr.msk.bf16.mxu1 %vm2477_vm1, %v2476_v7 }
  0xd7   : > { %2170 = vmatprep.subr.bf16.mxu1 %v2476_v7  ;;  %2182 = vmatprep.subr.bf16.mxu0 %v2476_v7 }
  0xe0   : > { %2125 = vmatmul.mubr.msk.bf16.vlgmr.msra.gmra.mrb[0].mxu0 %vm278_vm2, %v2700_v48  ;;  %2167 = vmatmul.mubr.msk.bf16.vlgmr.msra.gmra.mrb[0].mxu1 %vm278_vm2, %v2660_v42 }
  0xe1   : > { %2171 = vmatpush3.bf16.msra.mxu1 %v2683_v47  ;;  %2183 = vmatpush3.bf16.msra.mxu0 %v2601_v30 }
  0xe2   : > { %2184 = vmatprep.mubr.msk.bf16.mxu0 %vm2477_vm1, %v2476_v7  ;;  %2172 = vmatprep.mubr.msk.bf16.mxu1 %vm2477_vm1, %v2476_v7 }
  0xe3   : > { %2176 = vmatprep.subr.bf16.mxu1 %v2476_v7  ;;  %2188 = vmatprep.subr.bf16.mxu0 %v2476_v7 }
  0xe8   : > { %2185 = vmatmul.mubr.msk.bf16.vlgmr.msra.gmra.mrb[4].mxu0 %vm278_vm2, %v2554_v15 }
  0xe9   : > { %2189 = vmatpush3.bf16.msra.mxu0 %v2581_v26  ;;  %2190 = vmatprep.mubr.msk.bf16.mxu0 %vm2477_vm1, %v2476_v7 }
  0xea   : > { %2194 = vmatprep.subr.bf16.mxu0 %v2476_v7 }
  0xec   : > { %2173 = vmatmul.mubr.msk.bf16.vlgmr.msra.gmra.mrb[0].mxu1 %vm278_vm2, %v2680_v46 }
  0xed   : > { %2177 = vmatpush3.bf16.msra.mxu1 %v1082_v50  ;;  %2178 = vmatprep.mubr.msk.bf16.mxu1 %vm2477_vm1, %v2476_v7 }
  0xee   : > { %2236 = vmatprep.subr.bf16.mxu1 %v2476_v7 }
  0xf4   : > { %2191 = vmatmul.mubr.msk.bf16.vlgmr.msra.gmra.mrb[4].mxu0 %vm278_vm2, %v2566_v22 }
  0xf5   : > { %2195 = vmatpush3.bf16.msra.mxu0 %v2620_v33  ;;  %2196 = vmatprep.mubr.msk.bf16.mxu0 %vm2477_vm1, %v2476_v7 }
  0xf6   : > { %2200 = vmatprep.subr.bf16.mxu0 %v2476_v7 }
  0xf8   : > { %2179 = vmatmul.mubr.msk.bf16.vlgmr.msra.gmra.mrb[0].mxu1 %vm278_vm2, %v2700_v48 }
  0xf9   : > { %2237 = vmatpush3.bf16.msra.mxu1 %v2620_v33  ;;  %2238 = vmatprep.mubr.msk.bf16.mxu1 %vm2477_vm1, %v2476_v7 }
  0xfa   : > { %2242 = vmatprep.subr.bf16.mxu1 %v2476_v7 }
 0x100   : > { %2197 = vmatmul.mubr.msk.bf16.vlgmr.msra.gmra.mrb[4].mxu0 %vm278_vm2, %v2576_v25  ;;  %2239 = vmatmul.mubr.msk.bf16.vlgmr.msra.gmra.mrb[4].mxu1 %vm278_vm2, %v2554_v15 }
 0x101   : > { %2201 = vmatpush3.bf16.msra.mxu0 %v586_v39  ;;  %2243 = vmatpush3.bf16.msra.mxu1 %v2601_v30 }
 0x102   : > { %2202 = vmatprep.mubr.msk.bf16.mxu0 %vm2477_vm1, %v2476_v7  ;;  %2206 = vmatprep.subr.bf16.mxu0 %v2476_v7 }
 0x103   : > { %2244 = vmatprep.mubr.msk.bf16.mxu1 %vm2477_vm1, %v2476_v7  ;;  %2248 = vmatprep.subr.bf16.mxu1 %v2476_v7 }
 0x10c   : > { %2203 = vmatmul.mubr.msk.bf16.vlgmr.msra.gmra.mrb[4].mxu0 %vm278_vm2, %v2597_v28  ;;  %2245 = vmatmul.mubr.msk.bf16.vlgmr.msra.gmra.mrb[4].mxu1 %vm278_vm2, %v2566_v22 }
 0x10d   : > { %2207 = vmatpush3.bf16.msra.mxu0 %v2664_v44  ;;  %2249 = vmatpush3.bf16.msra.mxu1 %v954_v43 }
 0x10e   : > { %2208 = vmatprep.mubr.msk.bf16.mxu0 %vm2477_vm1, %v2476_v7  ;;  %2212 = vmatprep.subr.bf16.mxu0 %v2476_v7 }
 0x10f   : > { %2250 = vmatprep.mubr.msk.bf16.mxu1 %vm2477_vm1, %v2476_v7  ;;  %2254 = vmatprep.subr.bf16.mxu1 %v2476_v7 }
 0x118   : > { %2209 = vmatmul.mubr.msk.bf16.vlgmr.msra.gmra.mrb[4].mxu0 %vm278_vm2, %v2617_v32  ;;  %2251 = vmatmul.mubr.msk.bf16.vlgmr.msra.gmra.mrb[4].mxu1 %vm278_vm2, %v2576_v25 }
 0x119   : > { %2213 = vmatpush3.bf16.msra.mxu0 %v2683_v47  ;;  %2255 = vmatpush3.bf16.msra.mxu1 %v2664_v44 }
 0x11a   : > { %2214 = vmatprep.mubr.msk.bf16.mxu0 %vm2477_vm1, %v2476_v7  ;;  %2256 = vmatprep.mubr.msk.bf16.mxu1 %vm2477_vm1, %v2476_v7 }
 0x11b   : > { %2260 = vmatprep.subr.bf16.mxu1 %v2476_v7  ;;  %2218 = vmatprep.subr.bf16.mxu0 %v2476_v7 }
 0x124   : > { %2215 = vmatmul.mubr.msk.bf16.vlgmr.msra.gmra.mrb[4].mxu0 %vm278_vm2, %v2643_v38  ;;  %2257 = vmatmul.mubr.msk.bf16.vlgmr.msra.gmra.mrb[4].mxu1 %vm278_vm2, %v2597_v28 }
 0x125   : > { %2261 = vmatpush3.bf16.msra.mxu1 %v2683_v47  ;;  %2219 = vmatpush3.bf16.msra.mxu0 %v1372_v52 }
 0x126   : > { %2220 = vmatprep.mubr.msk.bf16.mxu0 %vm2477_vm1, %v2476_v7  ;;  %2262 = vmatprep.mubr.msk.bf16.mxu1 %vm2477_vm1, %v2476_v7 }
 0x127   : > { %2266 = vmatprep.subr.bf16.mxu1 %v2476_v7  ;;  %2224 = vmatprep.subr.bf16.mxu0 %v2476_v7 }
 0x130   : > { %2221 = vmatmul.mubr.msk.bf16.vlgmr.msra.gmra.mrb[4].mxu0 %vm278_vm2, %v2660_v42  ;;  %2263 = vmatmul.mubr.msk.bf16.vlgmr.msra.gmra.mrb[4].mxu1 %vm278_vm2, %v2617_v32 }
 0x131   : > { %2267 = vmatpush3.bf16.msra.mxu1 %v1082_v50  ;;  %2225 = vmatpush3.bf16.msra.mxu0 %v1418_v54 }
 0x132   : > { %2226 = vmatprep.mubr.msk.bf16.mxu0 %vm2477_vm1, %v2476_v7  ;;  %2268 = vmatprep.mubr.msk.bf16.mxu1 %vm2477_vm1, %v2476_v7 }
 0x133   : > { %2272 = vmatprep.subr.bf16.mxu1 %v2476_v7  ;;  %2230 = vmatprep.subr.bf16.mxu0 %v2476_v7 }
 0x13c   : > { %2227 = vmatmul.mubr.msk.bf16.vlgmr.msra.gmra.mrb[4].mxu0 %vm278_vm2, %v2680_v46  ;;  %2269 = vmatmul.mubr.msk.bf16.vlgmr.msra.gmra.mrb[4].mxu1 %vm278_vm2, %v2643_v38 }
 0x13d   : > { %2273 = vmatpush3.bf16.msra.mxu1 %v1418_v54  ;;  %2231 = vmatpush3.bf16.msra.mxu0 %v1464_v56 }
 0x13e   : > { %2232 = vmatprep.mubr.msk.bf16.mxu0 %vm2477_vm1, %v2476_v7  ;;  %2274 = vmatprep.mubr.msk.bf16.mxu1 %vm2477_vm1, %v2476_v7 }
 0x13f   : > { %2278 = vmatprep.subr.bf16.mxu1 %v2476_v7 }
 0x148   : > { %2233 = vmatmul.mubr.msk.bf16.vlgmr.msra.gmra.mrb[4].mxu0 %vm278_vm2, %v2700_v48  ;;  %2275 = vmatmul.mubr.msk.bf16.vlgmr.msra.gmra.mrb[4].mxu1 %vm278_vm2, %v2660_v42 }
 0x149   : > { %2279 = vmatpush3.bf16.msra.mxu1 %v1464_v56  ;;  %2280 = vmatprep.mubr.msk.bf16.mxu1 %vm2477_vm1, %v2476_v7 }
 0x14a   : > { %2284 = vmatprep.subr.bf16.mxu1 %v2476_v7 }
 0x154   : > { %2281 = vmatmul.mubr.msk.bf16.vlgmr.msra.gmra.mrb[4].mxu1 %vm278_vm2, %v2680_v46 }
 0x155   : > { %2285 = vmatpush3.bf16.msra.mxu1 %v1836_v58  ;;  %2286 = vmatprep.mubr.msk.bf16.mxu1 %vm2477_vm1, %v2476_v7 }
 0x160   : > { %2287 = vmatmul.mubr.msk.bf16.vlgmr.msra.gmra.mrb[4].mxu1 %vm278_vm2, %v2700_v48 }
 0x1b3   : > { %v728_v59 = vpop.f32.mrb[0].mxu0 }
 0x1b4   : > { %v2126_v60 = vpop.f32.mrb[1].mxu0  ;;  %v1879_v0 = vmul.f32 %v728_v59, %v263_v63 }
 0x1b5   : > { %v731_v61 = vpop.f32.mrb[2].mxu0 }
 0x1b6   : > { %v2127_v62 = vpop.f32.mrb[3].mxu0  ;;  %v1880_v6 = vadd.f32 %v1879_v0, %v269_v1 }
 0x1cb   : > { %v1118_v2 = vpop.f32.mrb[0].mxu1 }
 0x1cc   : > { %v1881_v3 = vmul.f32 %v1118_v2, %v263_v63  ;;  %v2180_v4 = vpop.f32.mrb[1].mxu1 }
 0x1cd   : > { %v1121_v5 = vpop.f32.mrb[2].mxu1 }
 0x1ce   : > { %v1882_v8 = vadd.f32 %v1881_v3, %v269_v1  ;;  %v2181_v9 = vpop.f32.mrb[3].mxu1 }
 0x1d0   : > { %v1883_v7 = vmax.f32 %v1880_v6, %v1882_v8 }
 0x21b   : > { %v1500_v10 = vpop.f32.mrb[4].mxu0 }
 0x21c   : > { %v1884_v11 = vmul.f32 %v1500_v10, %v263_v63  ;;  %v2234_v12 = vpop.f32.mrb[5].mxu0 }
 0x21d   : > { %v1503_v13 = vpop.f32.mrb[6].mxu0 }
 0x21e   : > { %v1885_v14 = vadd.f32 %v1884_v11, %v269_v1  ;;  %v2235_v15 = vpop.f32.mrb[7].mxu0 }
 0x220   : > { %v1886_v16 = vmax.f32 %v1883_v7, %v1885_v14 }
 0x233   : > { %v1872_v17 = vpop.f32.mrb[4].mxu1 }
 0x234   : > { %v1887_v18 = vmul.f32 %v1872_v17, %v263_v63  ;;  %v2288_v19 = vpop.f32.mrb[5].mxu1 }
 0x235   : > { %v1875_v20 = vpop.f32.mrb[6].mxu1 }
 0x236   : > { %v1888_v21 = vadd.f32 %v1887_v18, %v269_v1  ;;  %v2289_v22 = vpop.f32.mrb[7].mxu1 }
 0x238   : > { %v1889_v23 = vmax.f32 %v1886_v16, %v1888_v21 }
 0x23a   : > { %v1890_v24 = vmax.f32 %v1889_v23, 0.0 }
 0x23c   : > { %1892 = vst.msk [vmem:[%s248_s14] sm:$0xff] %vm1891_vm3, %v1890_v24 }
 0x23d PF: > { %p11_p9 = scmp.ge.s32.totalorder %s2524_s19, 4   ;;  %s2841_s15 = smov %s2469_s16 }
 0x23e   : > { %s2842_s16 = smov %s2533_s22  ;;  %s2843_s17 = smov %s2524_s19 }
 0x23f   :  { %13 = sbr.rel (!%p11_p9) target bundleno = 2 (0x2), region = 115 }

// kernel: convblock_forward.2
= control target key start
LH: loop header
LB: loop body
LE: loop exit
PB: predicated region body
PF: predicated region fallthrough
CT: control target
= control target key end

     0   :  { %s2572_s15 = smov 0   ;;  %s2574_s16 = smov 0   ;;  %s2909_s0 = inlined_call_operand.vmem [shape: bf16[4,2,4,89], index: 0, kind: input, shape index: {}]   ;;  %s2910_s1 = inlined_call_operand.vmem [shape: bf16[9,8,4], index: 1, kind: input, shape index: {}]   ;;  %s2911_s2 = inlined_call_operand.vmem [shape: f32[1,72], index: 2, kind: input, shape index: {}]   ;;  %s2912_s3 = inlined_call_operand.vmem [shape: f32[2,8,1], index: 3, kind: output, shape index: {0}]   ;;  %s2913_s4 = inlined_call_operand.vmem [shape: f32[2,8,1], index: 4, kind: output, shape index: {1}]  }
   0x1   :  { %s2576_s17 = smov 0  }
   0x2 LB: > { %s2019_s18 = sadd.s32 4294967295, %s2539_s17   ;;  %s2589_s19 = sadd.s32 1, %s2539_s17   ;;  %s2539_s17 = sphi %s2576_s17, %s2916_s17   ;;  %s2535_s16 = sphi %s2574_s16, %s2915_s16   ;;  %s2531_s15 = sphi %s2572_s15, %s2914_s15  }
   0x3   : > { %s19_s20 = ssub.s32 %s2539_s17, %s2589_s19  ;;  %s22_s21 = sadd.s32 1, %s2535_s16 }
   0x4   : > { %p20_p0 = scmp.eq.s32.totalorder %s19_s20, 0  ;;  %p29_p1 = scmp.ne.s32.totalorder %s2535_s16, %s2531_s15 }
   0x5   : > { %p30_p2 = scmp.eq.s32.totalorder %s2539_s17, 0  ;;  %p2022_p4 = scmp.ge.s32.totalorder %s2539_s17, 2 }
   0x6   : > { %s2598_s22 = scalar_select %p20_p0, %s2535_s16, %s22_s21  }
   0x7   : > { %p31_p3 = por %p30_p2, %p29_p1  ;;  %155 = sbr.rel (%p2022_p4) target bundleno = 21 (0x15), region = 24 }
   0xe   : > { %158 = sbr.rel (!%p31_p3) target bundleno = 21 (0x15), region = 28  ;;  %s160_s23 = sand.u32 (%p31_p3), 1, %s2535_s16  }
   0xf   : > { %s2024_s24 = sshll.u32 (%p31_p3), %s2539_s17, 1  ;;  %s2023_s25 = sshll.u32 (%p31_p3), %s160_s23, 3 }
  0x10   : > { %s164_s28 = scalar_lea.vmem (%p31_p3), %s2909_s0, %s2024_s24  ;;  %s162_s29 = scalar_lea.vmem (%p31_p3), [#allocation2], %s2023_s25 }
  0x11   : > { %v180_v0 = vld [vmem:[%s164_s28] sm:$0x3] (%p31_p3)  ;;  %v182_v1 = vld [vmem:[%s164_s28 + $0x4] sm:$0x3] (%p31_p3)  ;;  %v184_v2 = vld [vmem:[%s164_s28 + $0x8] sm:$0x3] (%p31_p3) }
  0x12   : > { %181 = vst [vmem:[%s162_s29] sm:$0x3] (%p31_p3), %v180_v0  ;;  %183 = vst [vmem:[%s162_s29 + $0x2] sm:$0x3] (%p31_p3), %v182_v1  ;;  %v186_v3 = vld [vmem:[%s164_s28 + $0xc] sm:$0x3] (%p31_p3) }
  0x13   : > { %185 = vst [vmem:[%s162_s29 + $0x4] sm:$0x3] (%p31_p3), %v184_v2  ;;  %187 = vst [vmem:[%s162_s29 + $0x6] sm:$0x3] (%p31_p3), %v186_v3 }
  0x15 PF: > { %p2025_p5 = scmp.ge.s32.totalorder %s2539_s17, 1  ;;  %p217_p6 = scmp.lt.s32.totalorder %s2539_s17, 3 }
  0x17   : > { %p218_p7 = pnand %p2025_p5, %p217_p6 }
  0x18   : > { %s224_s30 = sand.u32 (!%p218_p7), 1, %s2531_s15   ;;  %v376_v4 = vlaneseq (!%p218_p7)  ;;  %v2541_v5 = vmov (!%p218_p7), 1983009808   ;;  %v2542_v7 = vmov (!%p218_p7), 0.0   ;;  %vm282_vm0 = vcmask (!%p218_p7), 1041408   ;;  %s2544_s9 = smov (!%p218_p7), 127  }
  0x19   : > { %221 = sbr.rel (%p218_p7) target bundleno = 714 (0x2ca), region = 69  ;;  %s2026_s5 = sshll.u32 (!%p218_p7), %s224_s30, 3  ;;  %v374_v6 = vunpack.c.l.s4 (!%p218_p7), %v2541_v5  ;;  %2143 = vmatprep.subr.bf16.mxu0 (!%p218_p7), %v2542_v7  ;;  %2197 = vmatprep.subr.bf16.mxu1 (!%p218_p7), %v2542_v7  ;;  %vm2543_vm1 = vmmov (!%p218_p7), 0   ;;  %v2619_v15 = vld [vmem:[%s2910_s1 + $0x4] sm:$0xf] (!%p218_p7)  ;;  %vm278_vm2 = vcmask (!%p218_p7), 31744  }
  0x1a   : > { %v377_v8 = vshrl.u32 (!%p218_p7), %v376_v4, 7  ;;  %2145 = vmatprep.mubr.msk.bf16.mxu0 (!%p218_p7), %vm2543_vm1, %v2542_v7  ;;  %2199 = vmatprep.mubr.msk.bf16.mxu1 (!%p218_p7), %vm2543_vm1, %v2542_v7  ;;  %s226_s6 = scalar_lea.vmem (!%p218_p7), [#allocation2], %s2026_s5  ;;  %s2545_s10 = smov (!%p218_p7), 119   ;;  %v2631_v22 = vld [vmem:[%s2910_s1] sm:$0xf] (!%p218_p7)  ;;  %vm1886_vm3 = vcmask (!%p218_p7), 588800  }
  0x1b   : > { %v375_v9 = vunpack.c.0.s8 (!%p218_p7), %v374_v6  ;;  %v2029_v10 = vld [vmem:[%s226_s6 + $0x2] sm:$0x3] (!%p218_p7)  ;;  %v271_v11 = vld [vmem:[%s226_s6] sm:$0x3] (!%p218_p7)  ;;  %v2030_v12 = vld [vmem:[%s226_s6 + $0x4] sm:$0x3] (!%p218_p7) }
  0x1c   : > { %v284_v13 = vsel (!%p218_p7), %vm282_vm0, %v2029_v10, 0  ;;  %v2031_v16 = vld [vmem:[%s226_s6 + $0x6] sm:$0x3] (!%p218_p7)  ;;  %v330_v19 = vsel (!%p218_p7), %vm282_vm0, %v271_v11, 0  ;;  %s2546_s13 = smov (!%p218_p7), 118   ;;  %v2646_v26 = vsel (!%p218_p7), %vm282_vm0, %v2030_v12, 0 }
  0x1d   : > { %v378_v14 = vsub.s32 (!%p218_p7), %v375_v9, %v377_v8  ;;  %2144 = vmatpush3.bf16.msra.mxu0 (!%p218_p7), %v284_v13  ;;  %v2641_v25 = vld [vmem:[%s2910_s1 + $0x8] sm:$0xf] (!%p218_p7)  ;;  %v2662_v28 = vld [vmem:[%s2910_s1 + $0xc] sm:$0xf] (!%p218_p7)  ;;  %v2666_v30 = vsel (!%p218_p7), %vm282_vm0, %v2031_v16, 0  ;;  %p252_p8 = scmp.lt.s32.totalorder (!%p218_p7), %s2019_s18, 1 }
  0x1e   : > { %2149 = vmatprep.subr.bf16.mxu0 (!%p218_p7), %v2542_v7  ;;  %v2682_v32 = vld [vmem:[%s2910_s1 + $0x10] sm:$0xf] (!%p218_p7)  ;;  %v2702_v35 = vld [vmem:[%s2910_s1 + $0x14] sm:$0xf] (!%p218_p7)  ;;  %v2719_v39 = vld [vmem:[%s2910_s1 + $0x18] sm:$0xf] (!%p218_p7) }
  0x1f   : > { %v379_v17 = vrot.slane (!%p218_p7), %v271_v11, %v378_v14  ;;  %v530_v18 = vrot.slane (!%p218_p7), %v2030_v12, %v378_v14  ;;  %v636_v20 = vrot.slane (!%p218_p7), %v2029_v10, %v378_v14  ;;  %v950_v21 = vrot.slane (!%p218_p7), %v2031_v16, %v378_v14  ;;  %v2739_v43 = vld [vmem:[%s2910_s1 + $0x1c] sm:$0xf] (!%p218_p7)  ;;  %v2759_v45 = vld [vmem:[%s2910_s1 + $0x20] sm:$0xf] (!%p218_p7) }
  0x20   : > { %2146 = vmatmul.mubr.msk.bf16.vlgmr.msra.gmra.mrb[0].mxu0 %vm278_vm2, %v2619_v15  ;;  %v2068_v56 = vld [vmem:[%s2911_s2] ss:$0 sm:$0xff]  ;;  %s2918_s18 = smov (!%p252_p8, %s2019_s18), 1  ;;  %vm1926_vm4 = vcmask 7168  }
  0x21   : > { %380 = vrot.lane.b32.xlu0 %v379_v17, %s2544_s9  ;;  %531 = vrot.lane.b32.xlu1 %v530_v18, %s2544_s9 }
  0x22   : > { %2150 = vmatpush3.bf16.msra.mxu0 %v330_v19  ;;  %2151 = vmatprep.mubr.msk.bf16.mxu0 %vm2543_vm1, %v2542_v7 }
  0x23   : > { %2155 = vmatprep.subr.bf16.mxu0 %v2542_v7 }
  0x25   : > { %815 = vrot.lane.b32.xlu0 %v636_v20, %s2544_s9  ;;  %951 = vrot.lane.b32.xlu1 %v950_v21, %s2544_s9  ;;  %s2027_s9 = sshll.u32 %s2918_s18, 3 }
  0x26   : > { %s255_s12 = scalar_lea.vmem %s2912_s3, %s2027_s9  ;;  %s259_s17 = scalar_lea.vmem %s2913_s4, %s2027_s9 }
  0x29   : > { %580 = vrot.lane.b32.xlu0 %v379_v17, %s2545_s10  ;;  %637 = vrot.lane.b32.xlu1 %v636_v20, %s2545_s10 }
  0x2c   : > { %2152 = vmatmul.mubr.msk.bf16.vlgmr.msra.gmra.mrb[0].mxu0 %vm278_vm2, %v2631_v22 }
  0x2d   : > { %686 = vrot.lane.b32.xlu0 %v379_v17, %s2546_s13  ;;  %1079 = vrot.lane.b32.xlu1 %v636_v20, %s2546_s13 }
  0x2e   : > { %2157 = vmatprep.mubr.msk.bf16.mxu0 %vm2543_vm1, %v2542_v7 }
  0x31   : > { %1369 = vrot.lane.b32.xlu0 %v530_v18, %s2545_s10  ;;  %1415 = vrot.lane.b32.xlu1 %v950_v21, %s2545_s10 }
  0x35   : > { %1461 = vrot.lane.b32.xlu0 %v530_v18, %s2546_s13  ;;  %1833 = vrot.lane.b32.xlu1 %v950_v21, %s2546_s13 }
  0x93   : > { %v381_v23 = vpop.permute.xlu0 %380  ;;  %v532_v31 = vpop.permute.xlu1 %531 }
  0x94   : > { %v386_v24 = vsel %vm282_vm0, %v381_v23, 0  ;;  %v2685_v33 = vsel %vm282_vm0, %v532_v31, 0 }
  0x95   : > { %2156 = vmatpush3.bf16.msra.mxu0 %v386_v24  ;;  %2198 = vmatpush3.bf16.msra.mxu1 %v386_v24 }
  0x96   : > { %2203 = vmatprep.subr.bf16.mxu1 %v2542_v7  ;;  %2161 = vmatprep.subr.bf16.mxu0 %v2542_v7 }
  0x97   : > { %v816_v27 = vpop.permute.xlu0 %815  ;;  %v952_v37 = vpop.permute.xlu1 %951 }
  0x98   : > { %2158 = vmatmul.mubr.msk.bf16.vlgmr.msra.gmra.mrb[0].mxu0 %vm278_vm2, %v2641_v25  ;;  %2200 = vmatmul.mubr.msk.bf16.vlgmr.msra.gmra.mrb[0].mxu1 %vm278_vm2, %v2619_v15  ;;  %v818_v29 = vsel %vm282_vm0, %v816_v27, 0  ;;  %v954_v40 = vsel %vm282_vm0, %v952_v37, 0 }
  0x99   : > { %2204 = vmatpush3.bf16.msra.mxu1 %v284_v13  ;;  %2162 = vmatpush3.bf16.msra.mxu0 %v2646_v26 }
  0x9a   : > { %2205 = vmatprep.mubr.msk.bf16.mxu1 %vm2543_vm1, %v2542_v7  ;;  %2163 = vmatprep.mubr.msk.bf16.mxu0 %vm2543_vm1, %v2542_v7 }
  0x9b   : > { %2209 = vmatprep.subr.bf16.mxu1 %v2542_v7  ;;  %2167 = vmatprep.subr.bf16.mxu0 %v2542_v7  ;;  %v581_v34 = vpop.permute.xlu0 %580  ;;  %v638_v38 = vpop.permute.xlu1 %637 }
  0x9c   : > { %v586_v36 = vsel %vm282_vm0, %v581_v34, 0  ;;  %v2723_v41 = vsel %vm282_vm0, %v638_v38, 0 }
  0x9f   : > { %v687_v42 = vpop.permute.xlu0 %686  ;;  %v1080_v46 = vpop.permute.xlu1 %1079 }
  0xa0   : > { %v2742_v44 = vsel %vm282_vm0, %v687_v42, 0  ;;  %v1082_v47 = vsel %vm282_vm0, %v1080_v46, 0 }
  0xa3   : > { %v1370_v48 = vpop.permute.xlu0 %1369  ;;  %v1416_v50 = vpop.permute.xlu1 %1415 }
  0xa4   : > { %2164 = vmatmul.mubr.msk.bf16.vlgmr.msra.gmra.mrb[0].mxu0 %vm278_vm2, %v2662_v28  ;;  %2206 = vmatmul.mubr.msk.bf16.vlgmr.msra.gmra.mrb[0].mxu1 %vm278_vm2, %v2631_v22  ;;  %v1372_v49 = vsel %vm282_vm0, %v1370_v48, 0  ;;  %v1418_v51 = vsel %vm282_vm0, %v1416_v50, 0 }
  0xa5   : > { %2210 = vmatpush3.bf16.msra.mxu1 %v818_v29  ;;  %2168 = vmatpush3.bf16.msra.mxu0 %v2666_v30 }
  0xa6   : > { %2169 = vmatprep.mubr.msk.bf16.mxu0 %vm2543_vm1, %v2542_v7  ;;  %2211 = vmatprep.mubr.msk.bf16.mxu1 %vm2543_vm1, %v2542_v7 }
  0xa7   : > { %2215 = vmatprep.subr.bf16.mxu1 %v2542_v7  ;;  %2173 = vmatprep.subr.bf16.mxu0 %v2542_v7  ;;  %v1462_v52 = vpop.permute.xlu0 %1461  ;;  %v1834_v54 = vpop.permute.xlu1 %1833 }
  0xa8   : > { %v1464_v53 = vsel %vm282_vm0, %v1462_v52, 0  ;;  %v1836_v55 = vsel %vm282_vm0, %v1834_v54, 0 }
  0xb0   : > { %2170 = vmatmul.mubr.msk.bf16.vlgmr.msra.gmra.mrb[0].mxu0 %vm278_vm2, %v2682_v32  ;;  %2212 = vmatmul.mubr.msk.bf16.vlgmr.msra.gmra.mrb[0].mxu1 %vm278_vm2, %v2641_v25 }
  0xb1   : > { %2216 = vmatpush3.bf16.msra.mxu1 %v2666_v30  ;;  %2174 = vmatpush3.bf16.msra.mxu0 %v2685_v33 }
  0xb2   : > { %2175 = vmatprep.mubr.msk.bf16.mxu0 %vm2543_vm1, %v2542_v7  ;;  %2217 = vmatprep.mubr.msk.bf16.mxu1 %vm2543_vm1, %v2542_v7 }
  0xb3   : > { %2221 = vmatprep.subr.bf16.mxu1 %v2542_v7  ;;  %2179 = vmatprep.subr.bf16.mxu0 %v2542_v7 }
  0xbc   : > { %2176 = vmatmul.mubr.msk.bf16.vlgmr.msra.gmra.mrb[0].mxu0 %vm278_vm2, %v2702_v35  ;;  %2218 = vmatmul.mubr.msk.bf16.vlgmr.msra.gmra.mrb[0].mxu1 %vm278_vm2, %v2662_v28 }
  0xbd   : > { %2222 = vmatpush3.bf16.msra.mxu1 %v2685_v33  ;;  %2180 = vmatpush3.bf16.msra.mxu0 %v586_v36 }
  0xbe   : > { %2181 = vmatprep.mubr.msk.bf16.mxu0 %vm2543_vm1, %v2542_v7  ;;  %2223 = vmatprep.mubr.msk.bf16.mxu1 %vm2543_vm1, %v2542_v7 }
  0xbf   : > { %2227 = vmatprep.subr.bf16.mxu1 %v2542_v7  ;;  %2185 = vmatprep.subr.bf16.mxu0 %v2542_v7 }
  0xc8   : > { %2182 = vmatmul.mubr.msk.bf16.vlgmr.msra.gmra.mrb[0].mxu0 %vm278_vm2, %v2719_v39  ;;  %2224 = vmatmul.mubr.msk.bf16.vlgmr.msra.gmra.mrb[0].mxu1 %vm278_vm2, %v2682_v32 }
  0xc9   : > { %2228 = vmatpush3.bf16.msra.mxu1 %v954_v40  ;;  %2186 = vmatpush3.bf16.msra.mxu0 %v2723_v41 }
  0xca   : > { %2187 = vmatprep.mubr.msk.bf16.mxu0 %vm2543_vm1, %v2542_v7  ;;  %2229 = vmatprep.mubr.msk.bf16.mxu1 %vm2543_vm1, %v2542_v7 }
  0xcb   : > { %2233 = vmatprep.subr.bf16.mxu1 %v2542_v7  ;;  %2191 = vmatprep.subr.bf16.mxu0 %v2542_v7 }
  0xd4   : > { %2188 = vmatmul.mubr.msk.bf16.vlgmr.msra.gmra.mrb[0].mxu0 %vm278_vm2, %v2739_v43  ;;  %2230 = vmatmul.mubr.msk.bf16.vlgmr.msra.gmra.mrb[0].mxu1 %vm278_vm2, %v2702_v35 }
  0xd5   : > { %2234 = vmatpush3.bf16.msra.mxu1 %v2723_v41  ;;  %2192 = vmatpush3.bf16.msra.mxu0 %v2742_v44 }
  0xd6   : > { %2193 = vmatprep.mubr.msk.bf16.mxu0 %vm2543_vm1, %v2542_v7  ;;  %2235 = vmatprep.mubr.msk.bf16.mxu1 %vm2543_vm1, %v2542_v7 }
  0xd7   : > { %2239 = vmatprep.subr.bf16.mxu1 %v2542_v7  ;;  %2251 = vmatprep.subr.bf16.mxu0 %v2542_v7 }
  0xe0   : > { %2194 = vmatmul.mubr.msk.bf16.vlgmr.msra.gmra.mrb[0].mxu0 %vm278_vm2, %v2759_v45  ;;  %2236 = vmatmul.mubr.msk.bf16.vlgmr.msra.gmra.mrb[0].mxu1 %vm278_vm2, %v2719_v39 }
  0xe1   : > { %2240 = vmatpush3.bf16.msra.mxu1 %v2742_v44  ;;  %2252 = vmatpush3.bf16.msra.mxu0 %v2666_v30 }
  0xe2   : > { %2253 = vmatprep.mubr.msk.bf16.mxu0 %vm2543_vm1, %v2542_v7  ;;  %2241 = vmatprep.mubr.msk.bf16.mxu1 %vm2543_vm1, %v2542_v7 }
  0xe3   : > { %2245 = vmatprep.subr.bf16.mxu1 %v2542_v7  ;;  %2257 = vmatprep.subr.bf16.mxu0 %v2542_v7 }
  0xe8   : > { %2254 = vmatmul.mubr.msk.bf16.vlgmr.msra.gmra.mrb[4].mxu0 %vm278_vm2, %v2619_v15 }
  0xe9   : > { %2258 = vmatpush3.bf16.msra.mxu0 %v2646_v26  ;;  %2259 = vmatprep.mubr.msk.bf16.mxu0 %vm2543_vm1, %v2542_v7 }
  0xea   : > { %2263 = vmatprep.subr.bf16.mxu0 %v2542_v7 }
  0xec   : > { %2242 = vmatmul.mubr.msk.bf16.vlgmr.msra.gmra.mrb[0].mxu1 %vm278_vm2, %v2739_v43 }
  0xed   : > { %2246 = vmatpush3.bf16.msra.mxu1 %v1082_v47  ;;  %2247 = vmatprep.mubr.msk.bf16.mxu1 %vm2543_vm1, %v2542_v7 }
  0xee   : > { %2305 = vmatprep.subr.bf16.mxu1 %v2542_v7 }
  0xf4   : > { %2260 = vmatmul.mubr.msk.bf16.vlgmr.msra.gmra.mrb[4].mxu0 %vm278_vm2, %v2631_v22 }
  0xf5   : > { %2264 = vmatpush3.bf16.msra.mxu0 %v2685_v33  ;;  %2265 = vmatprep.mubr.msk.bf16.mxu0 %vm2543_vm1, %v2542_v7 }
  0xf6   : > { %2269 = vmatprep.subr.bf16.mxu0 %v2542_v7 }
  0xf8   : > { %2248 = vmatmul.mubr.msk.bf16.vlgmr.msra.gmra.mrb[0].mxu1 %vm278_vm2, %v2759_v45 }
  0xf9   : > { %2306 = vmatpush3.bf16.msra.mxu1 %v2685_v33  ;;  %2307 = vmatprep.mubr.msk.bf16.mxu1 %vm2543_vm1, %v2542_v7 }
  0xfa   : > { %2311 = vmatprep.subr.bf16.mxu1 %v2542_v7 }
 0x100   : > { %2266 = vmatmul.mubr.msk.bf16.vlgmr.msra.gmra.mrb[4].mxu0 %vm278_vm2, %v2641_v25  ;;  %2308 = vmatmul.mubr.msk.bf16.vlgmr.msra.gmra.mrb[4].mxu1 %vm278_vm2, %v2619_v15 }
 0x101   : > { %2270 = vmatpush3.bf16.msra.mxu0 %v586_v36  ;;  %2312 = vmatpush3.bf16.msra.mxu1 %v2666_v30 }
 0x102   : > { %2271 = vmatprep.mubr.msk.bf16.mxu0 %vm2543_vm1, %v2542_v7  ;;  %2275 = vmatprep.subr.bf16.mxu0 %v2542_v7 }
 0x103   : > { %2313 = vmatprep.mubr.msk.bf16.mxu1 %vm2543_vm1, %v2542_v7  ;;  %2317 = vmatprep.subr.bf16.mxu1 %v2542_v7 }
 0x10c   : > { %2272 = vmatmul.mubr.msk.bf16.vlgmr.msra.gmra.mrb[4].mxu0 %vm278_vm2, %v2662_v28  ;;  %2314 = vmatmul.mubr.msk.bf16.vlgmr.msra.gmra.mrb[4].mxu1 %vm278_vm2, %v2631_v22 }
 0x10d   : > { %2276 = vmatpush3.bf16.msra.mxu0 %v2723_v41  ;;  %2318 = vmatpush3.bf16.msra.mxu1 %v954_v40 }
 0x10e   : > { %2277 = vmatprep.mubr.msk.bf16.mxu0 %vm2543_vm1, %v2542_v7  ;;  %2281 = vmatprep.subr.bf16.mxu0 %v2542_v7 }
 0x10f   : > { %2319 = vmatprep.mubr.msk.bf16.mxu1 %vm2543_vm1, %v2542_v7  ;;  %2323 = vmatprep.subr.bf16.mxu1 %v2542_v7 }
 0x118   : > { %2278 = vmatmul.mubr.msk.bf16.vlgmr.msra.gmra.mrb[4].mxu0 %vm278_vm2, %v2682_v32  ;;  %2320 = vmatmul.mubr.msk.bf16.vlgmr.msra.gmra.mrb[4].mxu1 %vm278_vm2, %v2641_v25 }
 0x119   : > { %2282 = vmatpush3.bf16.msra.mxu0 %v2742_v44  ;;  %2324 = vmatpush3.bf16.msra.mxu1 %v2723_v41 }
 0x11a   : > { %2283 = vmatprep.mubr.msk.bf16.mxu0 %vm2543_vm1, %v2542_v7  ;;  %2325 = vmatprep.mubr.msk.bf16.mxu1 %vm2543_vm1, %v2542_v7 }
 0x11b   : > { %2329 = vmatprep.subr.bf16.mxu1 %v2542_v7  ;;  %2287 = vmatprep.subr.bf16.mxu0 %v2542_v7 }
 0x124   : > { %2284 = vmatmul.mubr.msk.bf16.vlgmr.msra.gmra.mrb[4].mxu0 %vm278_vm2, %v2702_v35  ;;  %2326 = vmatmul.mubr.msk.bf16.vlgmr.msra.gmra.mrb[4].mxu1 %vm278_vm2, %v2662_v28 }
 0x125   : > { %2330 = vmatpush3.bf16.msra.mxu1 %v2742_v44  ;;  %2288 = vmatpush3.bf16.msra.mxu0 %v1372_v49 }
 0x126   : > { %2289 = vmatprep.mubr.msk.bf16.mxu0 %vm2543_vm1, %v2542_v7  ;;  %2331 = vmatprep.mubr.msk.bf16.mxu1 %vm2543_vm1, %v2542_v7 }
 0x127   : > { %2335 = vmatprep.subr.bf16.mxu1 %v2542_v7  ;;  %2293 = vmatprep.subr.bf16.mxu0 %v2542_v7 }
 0x130   : > { %2290 = vmatmul.mubr.msk.bf16.vlgmr.msra.gmra.mrb[4].mxu0 %vm278_vm2, %v2719_v39  ;;  %2332 = vmatmul.mubr.msk.bf16.vlgmr.msra.gmra.mrb[4].mxu1 %vm278_vm2, %v2682_v32 }
 0x131   : > { %2336 = vmatpush3.bf16.msra.mxu1 %v1082_v47  ;;  %2294 = vmatpush3.bf16.msra.mxu0 %v1418_v51 }
 0x132   : > { %2295 = vmatprep.mubr.msk.bf16.mxu0 %vm2543_vm1, %v2542_v7  ;;  %2337 = vmatprep.mubr.msk.bf16.mxu1 %vm2543_vm1, %v2542_v7 }
 0x133   : > { %2341 = vmatprep.subr.bf16.mxu1 %v2542_v7  ;;  %2299 = vmatprep.subr.bf16.mxu0 %v2542_v7 }
 0x13c   : > { %2296 = vmatmul.mubr.msk.bf16.vlgmr.msra.gmra.mrb[4].mxu0 %vm278_vm2, %v2739_v43  ;;  %2338 = vmatmul.mubr.msk.bf16.vlgmr.msra.gmra.mrb[4].mxu1 %vm278_vm2, %v2702_v35 }
 0x13d   : > { %2342 = vmatpush3.bf16.msra.mxu1 %v1418_v51  ;;  %2300 = vmatpush3.bf16.msra.mxu0 %v1464_v53 }
 0x13e   : > { %2301 = vmatprep.mubr.msk.bf16.mxu0 %vm2543_vm1, %v2542_v7  ;;  %2343 = vmatprep.mubr.msk.bf16.mxu1 %vm2543_vm1, %v2542_v7 }
 0x13f   : > { %2347 = vmatprep.subr.bf16.mxu1 %v2542_v7 }
 0x148   : > { %2302 = vmatmul.mubr.msk.bf16.vlgmr.msra.gmra.mrb[4].mxu0 %vm278_vm2, %v2759_v45  ;;  %2344 = vmatmul.mubr.msk.bf16.vlgmr.msra.gmra.mrb[4].mxu1 %vm278_vm2, %v2719_v39 }
 0x149   : > { %2348 = vmatpush3.bf16.msra.mxu1 %v1464_v53  ;;  %2349 = vmatprep.mubr.msk.bf16.mxu1 %vm2543_vm1, %v2542_v7 }
 0x14a   : > { %2353 = vmatprep.subr.bf16.mxu1 %v2542_v7 }
 0x154   : > { %2350 = vmatmul.mubr.msk.bf16.vlgmr.msra.gmra.mrb[4].mxu1 %vm278_vm2, %v2739_v43 }
 0x155   : > { %2354 = vmatpush3.bf16.msra.mxu1 %v1836_v55  ;;  %2355 = vmatprep.mubr.msk.bf16.mxu1 %vm2543_vm1, %v2542_v7 }
 0x160   : > { %2356 = vmatmul.mubr.msk.bf16.vlgmr.msra.gmra.mrb[4].mxu1 %vm278_vm2, %v2759_v45 }
 0x1b3   : > { %v728_v57 = vpop.f32.mrb[0].mxu0 }
 0x1b4   : > { %v1885_v58 = vmul.f32 %v2068_v56, %v728_v57  ;;  %v2195_v59 = vpop.f32.mrb[1].mxu0 }
 0x1b5   : > { %v731_v60 = vpop.f32.mrb[2].mxu0 }
 0x1b6   : > { %v1891_v61 = vmul.f32 %v1885_v58, %v728_v57  ;;  %v2196_v62 = vpop.f32.mrb[3].mxu0  ;;  %v1887_v63 = vsel %vm1886_vm3, %v1885_v58, 0.0 }
 0x1b7   : > { %1888 = vadd.xlane.f32.xlu0 %v1887_v63 }
 0x1b8   : > { %v1892_v0 = vsel %vm1886_vm3, %v1891_v61, 0.0 }
 0x1b9   : > { %1893 = vadd.xlane.f32.xlu1 %v1892_v0 }
 0x1cb   : > { %v1118_v1 = vpop.f32.mrb[0].mxu1 }
 0x1cc   : > { %v1896_v2 = vmul.f32 %v2068_v56, %v1118_v1  ;;  %v2249_v3 = vpop.f32.mrb[1].mxu1 }
 0x1cd   : > { %v1121_v4 = vpop.f32.mrb[2].mxu1 }
 0x1ce   : > { %v1901_v5 = vmul.f32 %v1896_v2, %v1118_v1  ;;  %v2250_v6 = vpop.f32.mrb[3].mxu1  ;;  %v1897_v7 = vsel %vm1886_vm3, %v1896_v2, 0.0 }
 0x1cf   : > { %1898 = vadd.xlane.f32.xlu0 %v1897_v7 }
 0x1d0   : > { %v1902_v8 = vsel %vm1886_vm3, %v1901_v5, 0.0 }
 0x1d3   : > { %1903 = vadd.xlane.f32.xlu0 %v1902_v8 }
 0x21b   : > { %v1500_v9 = vpop.f32.mrb[4].mxu0 }
 0x21c   : > { %v1906_v10 = vmul.f32 %v2068_v56, %v1500_v9  ;;  %v2303_v11 = vpop.f32.mrb[5].mxu0 }
 0x21d   : > { %v1503_v12 = vpop.f32.mrb[6].mxu0 }
 0x21e   : > { %v1911_v13 = vmul.f32 %v1906_v10, %v1500_v9  ;;  %v2304_v14 = vpop.f32.mrb[7].mxu0  ;;  %v1907_v15 = vsel %vm1886_vm3, %v1906_v10, 0.0 }
 0x21f   : > { %1908 = vadd.xlane.f32.xlu1 %v1907_v15 }
 0x220   : > { %v1912_v16 = vsel %vm1886_vm3, %v1911_v13, 0.0 }
 0x221   : > { %1913 = vadd.xlane.f32.xlu0 %v1912_v16 }
 0x233   : > { %v1872_v17 = vpop.f32.mrb[4].mxu1 }
 0x234   : > { %v1916_v18 = vmul.f32 %v2068_v56, %v1872_v17  ;;  %v2357_v19 = vpop.f32.mrb[5].mxu1 }
 0x235   : > { %v1875_v20 = vpop.f32.mrb[6].mxu1 }
 0x236   : > { %v1921_v21 = vmul.f32 %v1916_v18, %v1872_v17  ;;  %v2358_v22 = vpop.f32.mrb[7].mxu1  ;;  %v1917_v23 = vsel %vm1886_vm3, %v1916_v18, 0.0 }
 0x237   : > { %1918 = vadd.xlane.f32.xlu1 %v1917_v23 }
 0x238   : > { %v1922_v24 = vsel %vm1886_vm3, %v1921_v21, 0.0 }
 0x239   : > { %1923 = vadd.xlane.f32.xlu0 %v1922_v24 }
 0x244   : > { %v1889_v25 = vpop.xlane.xlu0 %1888 }
 0x246   : > { %v1894_v27 = vpop.xlane.xlu1 %1893 }
 0x25c   : > { %v1899_v26 = vpop.xlane.xlu0 %1898 }
 0x25d   : > { %v1900_v30 = vadd.f32 %v1899_v26, %v1889_v25 }
 0x260   : > { %v1904_v28 = vpop.xlane.xlu0 %1903 }
 0x261   : > { %v1905_v32 = vadd.f32 %v1904_v28, %v1894_v27 }
 0x2ac   : > { %v1909_v29 = vpop.xlane.xlu1 %1908 }
 0x2ad   : > { %v1910_v33 = vadd.f32 %v1909_v29, %v1900_v30 }
 0x2ae   : > { %v1914_v31 = vpop.xlane.xlu0 %1913 }
 0x2af   : > { %v1915_v35 = vadd.f32 %v1914_v31, %v1905_v32 }
 0x2c4   : > { %v1919_v34 = vpop.xlane.xlu1 %1918 }
 0x2c5   : > { %v1920_v36 = vadd.f32 %v1919_v34, %v1910_v33 }
 0x2c6   : > { %v1924_v37 = vpop.xlane.xlu0 %1923 }
 0x2c7   : > { %1927 = vst.msk [vmem:[%s255_s12] sm:$0xff] %vm1926_vm4, %v1920_v36  ;;  %v1925_v38 = vadd.f32 %v1924_v37, %v1915_v35 }
 0x2c9   : > { %1928 = vst.msk [vmem:[%s259_s17] sm:$0xff] %vm1926_vm4, %v1925_v38 }
 0x2ca PF: > { %p12_p9 = scmp.ge.s32.totalorder %s2589_s19, 4   ;;  %s2914_s15 = smov %s2535_s16 }
 0x2cb   : > { %s2915_s16 = smov %s2598_s22  ;;  %s2916_s17 = smov %s2589_s19 }
 0x2cc   :  { %14 = sbr.rel (!%p12_p9) target bundleno = 2 (0x2), region = 123 }

</bundles_post_ra>
